<compile_context>
chip_gen: v6e
topology: v6e:2x2x1
jax: 0.10.0
libtpu: 0.0.40
codegen_flags: <defaults>
</compile_context>

<pallas_src>
import math

import jax
import jax.numpy as jnp
from jax.experimental import pallas as pl
from jax.experimental.pallas import tpu as pltpu


# ---------------------------- fused Pallas kernel ----------------------------

def make_residual_block_kernel(NB, H, W, C_pad):
    PW = W + 2                        # in-line padded row width
    HWI = H * PW                      # flat length of the H "interior" rows
    FLAT = (H + 3) * PW               # 1 top pad row + H rows + 2 bottom pad rows
    # taps of a 3x3 / padding=1 conv as contiguous slices of the padded flat image
    TAP_OFF = tuple(ky * PW + kx for ky in range(3) for kx in range(3))
    CENTER = PW + 1                   # (1,1) tap offset == interior / identity slice
    assert FLAT >= HWI + max(TAP_OFF), "padded flat image too short for 3x3 taps"
    assert TAP_OFF[4] == CENTER

    def dot9(taps, w_ref):
        # conv3x3 as 9 accumulating f32 (C_pad,C_pad)@(C_pad,HWI) MXU dots:
        # no im2col concat, no bf16 packing.
        acc = jnp.dot(w_ref[0], taps[0], preferred_element_type=jnp.float32)
        for t in range(1, 9):
            acc = acc + jnp.dot(w_ref[t], taps[t],
                                preferred_element_type=jnp.float32)
        return acc

    def kernel(xp_ref, w1_ref, b1_ref, w2_ref, b2_ref, out_ref, h1p_ref):
        # One-time zero of the haloed-h1 scratch: every step fully overwrites
        # the interior [CENTER, CENTER+HWI), so the halo stays zero across
        # steps.  (If the batch is ever chunked across a multi-core "parallel"
        # axis, move this zero back into the per-step body.)
        @pl.when(pl.program_id(0) == 0)
        def _():
            h1p_ref[...] = jnp.zeros(h1p_ref.shape, h1p_ref.dtype)

        for n in range(NB):                            # unrolled over block's images
            xpn = xp_ref[n]                            # (C_pad, FLAT) f32
            t1 = [xpn[:, o:o + HWI] for o in TAP_OFF]  # nine (C_pad, HWI) taps
            center = t1[4]                             # interior view == identity path
            # in-band mask: the last padded channel is 1 on valid pixels and 0
            # on the in-line pad columns (its conv weights are zero).
            mask = center[C_pad - 1:C_pad, :]          # (1, HWI)

            # ---- stage 1: conv1 (BN1 scale pre-folded) + bias + ReLU --------
            # zero the in-line pad columns so they act as conv2's zero padding
            h1 = jnp.maximum(dot9(t1, w1_ref) + b1_ref[...], 0.0) * mask

            # ---- re-apply the 1-pixel halo around h1 in VMEM (never hits HBM)
            h1p_ref[n, :, CENTER:CENTER + HWI] = h1
            h1pn = h1p_ref[n]                          # (C_pad, FLAT)
            t2 = [h1pn[:, o:o + HWI] for o in TAP_OFF]

            # ---- stage 2: conv2 (BN2 scale pre-folded) + bias + id + ReLU ---
            y = jnp.maximum(dot9(t2, w2_ref) + b2_ref[...] + center, 0.0)
            out_ref[n] = y.astype(out_ref.dtype)

    return kernel


# ---------------------------- glue / wrapper ----------------------------

def residual_block_forward(x_nchw, params, images_per_step=None):
    """Matches ResidualBlock.forward (eval-mode BN). Input/output are NCHW."""
    w1, b1, w2, b2 = params
    N, C, H, W = x_nchw.shape
    C_pad = w1.shape[1]
    assert w1.shape == (9, C_pad, C_pad) and w2.shape == (9, C_pad, C_pad)
    assert b1.shape == (C_pad, 1) and b2.shape == (C_pad, 1)
    # TODO(synk): if C is already a multiple of 8 there is no spare channel for
    # the in-band mask; bump C_pad by 8 or pass the mask as a tiny extra input.
    assert C_pad > C, "in-band pad-column mask needs >=1 padded channel"

    if images_per_step is None:
        images_per_step = N   # whole batch in one grid step (overhead-bound regime)
    assert N % images_per_step == 0
    NB = images_per_step
    num_steps = N // NB

    PW = W + 2
    HWI = H * PW
    FLAT = (H + 3) * PW

    # Channels padded to C_pad; the LAST padded channel carries an all-ones
    # image so that, after the spatial zero-pad, its interior slice is exactly
    # the in-line pad-column mask the kernel needs (no separate mask input).
    x32 = x_nchw.astype(jnp.float32)
    extra = jnp.zeros((N, C_pad - C, H, W), jnp.float32).at[:, -1].set(1.0)
    xe = jnp.concatenate([x32, extra], axis=1)                 # (N, C_pad, H, W)
    # single zero-pad (no per-tap duplication): 1 row top / 2 bottom, 1 column
    # each side; flatten spatial so every 3x3 tap is a contiguous flat slice.
    xp = jnp.pad(xe, ((0, 0), (0, 0), (1, 2), (1, 1)))
    xp_flat = xp.reshape(N, C_pad, FLAT)

    kernel = make_residual_block_kernel(NB, H, W, C_pad)
    y_flat = pl.pallas_call(
        kernel,
        out_shape=jax.ShapeDtypeStruct((N, C_pad, HWI), jnp.float32),
        grid=(num_steps,),
        in_specs=[
            pl.BlockSpec((NB, C_pad, FLAT), lambda b: (b, 0, 0)),   # padded activations
            pl.BlockSpec((9, C_pad, C_pad), lambda b: (0, 0, 0)),   # w1 (f32, BN folded)
            pl.BlockSpec((C_pad, 1), lambda b: (0, 0)),             # b1 (f32)
            pl.BlockSpec((9, C_pad, C_pad), lambda b: (0, 0, 0)),   # w2 (f32, BN folded)
            pl.BlockSpec((C_pad, 1), lambda b: (0, 0)),             # b2 (f32)
        ],
        out_specs=pl.BlockSpec((NB, C_pad, HWI), lambda b: (b, 0, 0)),
        scratch_shapes=[pltpu.VMEM((NB, C_pad, FLAT), jnp.float32)],  # haloed h1
        compiler_params=pltpu.CompilerParams(
            dimension_semantics=("parallel",)),
    )(xp_flat, w1, b1, w2, b2)

    # drop padded channels and the 2 in-line pad columns of every row (those
    # columns hold unmasked conv values by design); result is NCHW.
    return y_flat.reshape(N, C_pad, H, PW)[:, :C, :, :W]


# ---------------------------- parameters ----------------------------

def _round_up(n, m):
    return ((n + m - 1) // m) * m


def init_raw_params(key, filters):
    """Deterministic synthetic parameters matching PyTorch shapes/layouts."""
    ks = jax.random.split(key, 12)
    bound = 1.0 / math.sqrt(filters * 9)  # Conv2d default init scale

    def conv_w(k):  # torch Conv2d weight layout: (Cout, Cin, 3, 3)
        return jax.random.uniform(k, (filters, filters, 3, 3), jnp.float32, -bound, bound)

    def conv_b(k):
        return jax.random.uniform(k, (filters,), jnp.float32, -bound, bound)

    def bn(k0, k1, k2, k3):
        gamma = jax.random.uniform(k0, (filters,), jnp.float32, 0.5, 1.5)
        beta = 0.1 * jax.random.normal(k1, (filters,), jnp.float32)
        mean = 0.1 * jax.random.normal(k2, (filters,), jnp.float32)
        var = jax.random.uniform(k3, (filters,), jnp.float32, 0.5, 1.5)
        return gamma, beta, mean, var

    return dict(
        w1=conv_w(ks[0]), cb1=conv_b(ks[1]), bn1=bn(ks[2], ks[3], ks[4], ks[5]),
        w2=conv_w(ks[6]), cb2=conv_b(ks[7]), bn2=bn(ks[8], ks[9], ks[10], ks[11]),
    )


def fold_params(raw, eps=1e-5):
    """Fold conv bias + eval-mode BN into kernel-ready f32 params.

    Per conv: w (9, C_pad, C_pad) with the BN scale folded in (tap t = ky*3+kx),
              b (C_pad, 1).  Padded rows/cols carry zeros (also gives the kernel
              C_pad=8 output rows for sublane-dense stores).
    """
    def fold(w_t, cb, bn_p):
        gamma, beta, mean, var = bn_p
        scale = gamma / jnp.sqrt(var + eps)                     # (Cout,)
        bias = (cb - mean) * scale + beta                       # (Cout,)
        cout, cin = w_t.shape[0], w_t.shape[1]
        c_pad = _round_up(max(cout, cin), 8)
        wm = w_t * scale[:, None, None, None]                   # (Cout, Cin, 3, 3)
        wm = jnp.transpose(wm, (2, 3, 0, 1)).reshape(9, cout, cin)
        wm = jnp.pad(wm, ((0, 0), (0, c_pad - cout), (0, c_pad - cin)))
        bias = jnp.pad(bias, (0, c_pad - cout))[:, None]
        return wm.astype(jnp.float32), bias.astype(jnp.float32)

    w1, b1 = fold(raw["w1"], raw["cb1"], raw["bn1"])
    w2, b2 = fold(raw["w2"], raw["cb2"], raw["bn2"])
    return w1, b1, w2, b2


# ---------------------------- reference (pure JAX) ----------------------------

def reference_forward(x_nchw, raw, eps=1e-5):
    x = jnp.transpose(x_nchw, (0, 2, 3, 1)).astype(jnp.float32)

    def conv(h, w_t, cb):
        w_hwio = jnp.transpose(w_t, (2, 3, 1, 0))
        y = jax.lax.conv_general_dilated(
            h, w_hwio, window_strides=(1, 1), padding="SAME",
            dimension_numbers=("NHWC", "HWIO", "NHWC"),
            precision=jax.lax.Precision.HIGHEST)
        return y + cb

    def bn(y, p):
        gamma, beta, mean, var = p
        return (y - mean) / jnp.sqrt(var + eps) * gamma + beta

    h = jax.nn.relu(bn(conv(x, raw["w1"], raw["cb1"]), raw["bn1"]))
    o = jax.nn.relu(bn(conv(h, raw["w2"], raw["cb2"]), raw["bn2"]) + x)
    return jnp.transpose(o, (0, 3, 1, 2))


# ---------------------------- main ----------------------------

if __name__ == "__main__":
    key = jax.random.PRNGKey(0)
    k_x, k_p = jax.random.split(key)

    N, C, H, W = 2, 4, 16, 16                                # filters = 4
    x = jax.random.normal(k_x, (N, C, H, W), jnp.float32)    # NCHW, as in PyTorch

    raw = init_raw_params(k_p, C)
    params = fold_params(raw)

    out = jax.block_until_ready(residual_block_forward(x, params))
    assert out.shape == (N, C, H, W)

    ref = reference_forward(x, raw)
    max_err = float(jnp.max(jnp.abs(out - ref)))
    # all-f32 MXU/epilogue path: observed error should be ~1e-5; gate loosely.
    if not bool(jnp.allclose(out, ref, atol=2e-2, rtol=2e-2)):
        raise AssertionError(f"Pallas output mismatch vs reference, max abs err = {max_err}")

    print("KERNEL_OK")
</pallas_src>

<mosaic_0001>
module attributes {stable_mosaic.version = 11 : i64} {
  func.func @kernel(%arg0: i32, %arg1: memref<2x8x342xf32, #tpu.memory_space<vmem>>, %arg2: memref<9x8x8xf32, #tpu.memory_space<vmem>>, %arg3: memref<8x1xf32, #tpu.memory_space<vmem>>, %arg4: memref<9x8x8xf32, #tpu.memory_space<vmem>>, %arg5: memref<8x1xf32, #tpu.memory_space<vmem>>, %arg6: memref<2x8x288xf32, #tpu.memory_space<vmem>>, %arg7: memref<2x8x342xf32, #tpu.memory_space<vmem>>) attributes {dimension_semantics = [#tpu.dimension_semantics<parallel>], iteration_bounds = array<i64: 1>, scalar_prefetch = 0 : i64, scratch_operands = 1 : i64, tpu.core_type = #tpu.core_type<tc>, window_params = [{transform_indices = @transform_0, window_bounds = array<i64: 2, 8, 342>}, {pipeline_mode = #tpu.pipeline_mode<synchronous>, transform_indices = @transform_1, window_bounds = array<i64: 9, 8, 8>}, {pipeline_mode = #tpu.pipeline_mode<synchronous>, transform_indices = @transform_2, window_bounds = array<i64: 8, 1>}, {pipeline_mode = #tpu.pipeline_mode<synchronous>, transform_indices = @transform_3, window_bounds = array<i64: 9, 8, 8>}, {pipeline_mode = #tpu.pipeline_mode<synchronous>, transform_indices = @transform_4, window_bounds = array<i64: 8, 1>}, {transform_indices = @transform_5, window_bounds = array<i64: 2, 8, 288>}]} {
    %c0_i32 = arith.constant 0 : i32
    %0 = arith.cmpi eq, %arg0, %c0_i32 : i32
    %1 = arith.extui %0 : i1 to i32
    %c0_i32_0 = arith.constant 0 : i32
    %2 = arith.cmpi ne, %1, %c0_i32_0 : i32
    scf.if %2 {
      %cst_170 = arith.constant 0.000000e+00 : f32
      %227 = vector.broadcast %cst_170 : f32 to vector<2x8x342xf32>
      %c0_171 = arith.constant 0 : index
      %c0_172 = arith.constant 0 : index
      %c0_173 = arith.constant 0 : index
      %228 = vector.load %arg7[%c0_171, %c0_172, %c0_173] : memref<2x8x342xf32, #tpu.memory_space<vmem>>, vector<2x8x342xf32>
      tpu.vector_store %arg7[%c0_171, %c0_172, %c0_173], %227 {strides = array<i32>} : memref<2x8x342xf32, #tpu.memory_space<vmem>>, vector<2x8x342xf32>,
    } else {
    }
    %c0 = arith.constant 0 : index
    %c0_1 = arith.constant 0 : index
    %c0_2 = arith.constant 0 : index
    %3 = vector.load %arg1[%c0, %c0_1, %c0_2] : memref<2x8x342xf32, #tpu.memory_space<vmem>>, vector<1x8x342xf32>
    %4 = vector.shape_cast %3 : vector<1x8x342xf32> to vector<8x342xf32>
    %5 = vector.extract_strided_slice %4 {offsets = [0, 0], sizes = [8, 288], strides = [1, 1]} : vector<8x342xf32> to vector<8x288xf32>
    %6 = vector.extract_strided_slice %4 {offsets = [0, 1], sizes = [8, 288], strides = [1, 1]} : vector<8x342xf32> to vector<8x288xf32>
    %7 = vector.extract_strided_slice %4 {offsets = [0, 2], sizes = [8, 288], strides = [1, 1]} : vector<8x342xf32> to vector<8x288xf32>
    %8 = vector.extract_strided_slice %4 {offsets = [0, 18], sizes = [8, 288], strides = [1, 1]} : vector<8x342xf32> to vector<8x288xf32>
    %9 = vector.extract_strided_slice %4 {offsets = [0, 19], sizes = [8, 288], strides = [1, 1]} : vector<8x342xf32> to vector<8x288xf32>
    %10 = vector.extract_strided_slice %4 {offsets = [0, 20], sizes = [8, 288], strides = [1, 1]} : vector<8x342xf32> to vector<8x288xf32>
    %11 = vector.extract_strided_slice %4 {offsets = [0, 36], sizes = [8, 288], strides = [1, 1]} : vector<8x342xf32> to vector<8x288xf32>
    %12 = vector.extract_strided_slice %4 {offsets = [0, 37], sizes = [8, 288], strides = [1, 1]} : vector<8x342xf32> to vector<8x288xf32>
    %13 = vector.extract_strided_slice %4 {offsets = [0, 38], sizes = [8, 288], strides = [1, 1]} : vector<8x342xf32> to vector<8x288xf32>
    %14 = vector.extract_strided_slice %9 {offsets = [7, 0], sizes = [1, 288], strides = [1, 1]} : vector<8x288xf32> to vector<1x288xf32>
    %c0_3 = arith.constant 0 : index
    %c0_4 = arith.constant 0 : index
    %c0_5 = arith.constant 0 : index
    %15 = vector.load %arg2[%c0_3, %c0_4, %c0_5] : memref<9x8x8xf32, #tpu.memory_space<vmem>>, vector<1x8x8xf32>
    %16 = vector.shape_cast %15 : vector<1x8x8xf32> to vector<8x8xf32>
    %cst = arith.constant dense<0.000000e+00> : vector<8x288xf32>
    %17 = tpu.matmul %16, %5, %cst {dimension_numbers = #tpu.dot_dimension_numbers<[1], [0], [0], [1], [0, 0, 1, 1], [], []>} : vector<8x8xf32>, vector<8x288xf32>, vector<8x288xf32> -> vector<8x288xf32>
    %c1 = arith.constant 1 : index
    %c0_6 = arith.constant 0 : index
    %c0_7 = arith.constant 0 : index
    %18 = vector.load %arg2[%c1, %c0_6, %c0_7] : memref<9x8x8xf32, #tpu.memory_space<vmem>>, vector<1x8x8xf32>
    %19 = vector.shape_cast %18 : vector<1x8x8xf32> to vector<8x8xf32>
    %cst_8 = arith.constant dense<0.000000e+00> : vector<8x288xf32>
    %20 = tpu.matmul %19, %6, %cst_8 {dimension_numbers = #tpu.dot_dimension_numbers<[1], [0], [0], [1], [0, 0, 1, 1], [], []>} : vector<8x8xf32>, vector<8x288xf32>, vector<8x288xf32> -> vector<8x288xf32>
    %21 = arith.addf %17, %20 : vector<8x288xf32>
    %c2 = arith.constant 2 : index
    %c0_9 = arith.constant 0 : index
    %c0_10 = arith.constant 0 : index
    %22 = vector.load %arg2[%c2, %c0_9, %c0_10] : memref<9x8x8xf32, #tpu.memory_space<vmem>>, vector<1x8x8xf32>
    %23 = vector.shape_cast %22 : vector<1x8x8xf32> to vector<8x8xf32>
    %cst_11 = arith.constant dense<0.000000e+00> : vector<8x288xf32>
    %24 = tpu.matmul %23, %7, %cst_11 {dimension_numbers = #tpu.dot_dimension_numbers<[1], [0], [0], [1], [0, 0, 1, 1], [], []>} : vector<8x8xf32>, vector<8x288xf32>, vector<8x288xf32> -> vector<8x288xf32>
    %25 = arith.addf %21, %24 : vector<8x288xf32>
    %c3 = arith.constant 3 : index
    %c0_12 = arith.constant 0 : index
    %c0_13 = arith.constant 0 : index
    %26 = vector.load %arg2[%c3, %c0_12, %c0_13] : memref<9x8x8xf32, #tpu.memory_space<vmem>>, vector<1x8x8xf32>
    %27 = vector.shape_cast %26 : vector<1x8x8xf32> to vector<8x8xf32>
    %cst_14 = arith.constant dense<0.000000e+00> : vector<8x288xf32>
    %28 = tpu.matmul %27, %8, %cst_14 {dimension_numbers = #tpu.dot_dimension_numbers<[1], [0], [0], [1], [0, 0, 1, 1], [], []>} : vector<8x8xf32>, vector<8x288xf32>, vector<8x288xf32> -> vector<8x288xf32>
    %29 = arith.addf %25, %28 : vector<8x288xf32>
    %c4 = arith.constant 4 : index
    %c0_15 = arith.constant 0 : index
    %c0_16 = arith.constant 0 : index
    %30 = vector.load %arg2[%c4, %c0_15, %c0_16] : memref<9x8x8xf32, #tpu.memory_space<vmem>>, vector<1x8x8xf32>
    %31 = vector.shape_cast %30 : vector<1x8x8xf32> to vector<8x8xf32>
    %cst_17 = arith.constant dense<0.000000e+00> : vector<8x288xf32>
    %32 = tpu.matmul %31, %9, %cst_17 {dimension_numbers = #tpu.dot_dimension_numbers<[1], [0], [0], [1], [0, 0, 1, 1], [], []>} : vector<8x8xf32>, vector<8x288xf32>, vector<8x288xf32> -> vector<8x288xf32>
    %33 = arith.addf %29, %32 : vector<8x288xf32>
    %c5 = arith.constant 5 : index
    %c0_18 = arith.constant 0 : index
    %c0_19 = arith.constant 0 : index
    %34 = vector.load %arg2[%c5, %c0_18, %c0_19] : memref<9x8x8xf32, #tpu.memory_space<vmem>>, vector<1x8x8xf32>
    %35 = vector.shape_cast %34 : vector<1x8x8xf32> to vector<8x8xf32>
    %cst_20 = arith.constant dense<0.000000e+00> : vector<8x288xf32>
    %36 = tpu.matmul %35, %10, %cst_20 {dimension_numbers = #tpu.dot_dimension_numbers<[1], [0], [0], [1], [0, 0, 1, 1], [], []>} : vector<8x8xf32>, vector<8x288xf32>, vector<8x288xf32> -> vector<8x288xf32>
    %37 = arith.addf %33, %36 : vector<8x288xf32>
    %c6 = arith.constant 6 : index
    %c0_21 = arith.constant 0 : index
    %c0_22 = arith.constant 0 : index
    %38 = vector.load %arg2[%c6, %c0_21, %c0_22] : memref<9x8x8xf32, #tpu.memory_space<vmem>>, vector<1x8x8xf32>
    %39 = vector.shape_cast %38 : vector<1x8x8xf32> to vector<8x8xf32>
    %cst_23 = arith.constant dense<0.000000e+00> : vector<8x288xf32>
    %40 = tpu.matmul %39, %11, %cst_23 {dimension_numbers = #tpu.dot_dimension_numbers<[1], [0], [0], [1], [0, 0, 1, 1], [], []>} : vector<8x8xf32>, vector<8x288xf32>, vector<8x288xf32> -> vector<8x288xf32>
    %41 = arith.addf %37, %40 : vector<8x288xf32>
    %c7 = arith.constant 7 : index
    %c0_24 = arith.constant 0 : index
    %c0_25 = arith.constant 0 : index
    %42 = vector.load %arg2[%c7, %c0_24, %c0_25] : memref<9x8x8xf32, #tpu.memory_space<vmem>>, vector<1x8x8xf32>
    %43 = vector.shape_cast %42 : vector<1x8x8xf32> to vector<8x8xf32>
    %cst_26 = arith.constant dense<0.000000e+00> : vector<8x288xf32>
    %44 = tpu.matmul %43, %12, %cst_26 {dimension_numbers = #tpu.dot_dimension_numbers<[1], [0], [0], [1], [0, 0, 1, 1], [], []>} : vector<8x8xf32>, vector<8x288xf32>, vector<8x288xf32> -> vector<8x288xf32>
    %45 = arith.addf %41, %44 : vector<8x288xf32>
    %c8 = arith.constant 8 : index
    %c0_27 = arith.constant 0 : index
    %c0_28 = arith.constant 0 : index
    %46 = vector.load %arg2[%c8, %c0_27, %c0_28] : memref<9x8x8xf32, #tpu.memory_space<vmem>>, vector<1x8x8xf32>
    %47 = vector.shape_cast %46 : vector<1x8x8xf32> to vector<8x8xf32>
    %cst_29 = arith.constant dense<0.000000e+00> : vector<8x288xf32>
    %48 = tpu.matmul %47, %13, %cst_29 {dimension_numbers = #tpu.dot_dimension_numbers<[1], [0], [0], [1], [0, 0, 1, 1], [], []>} : vector<8x8xf32>, vector<8x288xf32>, vector<8x288xf32> -> vector<8x288xf32>
    %49 = arith.addf %45, %48 : vector<8x288xf32>
    %c0_30 = arith.constant 0 : index
    %c0_31 = arith.constant 0 : index
    %50 = vector.load %arg3[%c0_30, %c0_31] : memref<8x1xf32, #tpu.memory_space<vmem>>, vector<8x1xf32>
    %51 = vector.broadcast %50 : vector<8x1xf32> to vector<8x288xf32>
    %52 = arith.addf %49, %51 : vector<8x288xf32>
    %cst_32 = arith.constant 0.000000e+00 : f32
    %53 = vector.broadcast %cst_32 : f32 to vector<8x288xf32>
    %54 = arith.maximumf %52, %53 : vector<8x288xf32>
    %55 = vector.broadcast %14 : vector<1x288xf32> to vector<8x288xf32>
    %56 = arith.mulf %54, %55 : vector<8x288xf32>
    %c0_33 = arith.constant 0 : index
    %c0_34 = arith.constant 0 : index
    %c19 = arith.constant 19 : index
    %57 = vector.load %arg7[%c0_33, %c0_34, %c19] : memref<2x8x342xf32, #tpu.memory_space<vmem>>, vector<1x8x288xf32>
    %58 = vector.shape_cast %57 : vector<1x8x288xf32> to vector<8x288xf32>
    %59 = vector.shape_cast %56 : vector<8x288xf32> to vector<1x8x288xf32>
    tpu.vector_store %arg7[%c0_33, %c0_34, %c19], %59 {strides = array<i32>} : memref<2x8x342xf32, #tpu.memory_space<vmem>>, vector<1x8x288xf32>,
    %c0_35 = arith.constant 0 : index
    %c0_36 = arith.constant 0 : index
    %c0_37 = arith.constant 0 : index
    %60 = vector.load %arg7[%c0_35, %c0_36, %c0_37] : memref<2x8x342xf32, #tpu.memory_space<vmem>>, vector<1x8x342xf32>
    %61 = vector.shape_cast %60 : vector<1x8x342xf32> to vector<8x342xf32>
    %62 = vector.extract_strided_slice %61 {offsets = [0, 0], sizes = [8, 288], strides = [1, 1]} : vector<8x342xf32> to vector<8x288xf32>
    %63 = vector.extract_strided_slice %61 {offsets = [0, 1], sizes = [8, 288], strides = [1, 1]} : vector<8x342xf32> to vector<8x288xf32>
    %64 = vector.extract_strided_slice %61 {offsets = [0, 2], sizes = [8, 288], strides = [1, 1]} : vector<8x342xf32> to vector<8x288xf32>
    %65 = vector.extract_strided_slice %61 {offsets = [0, 18], sizes = [8, 288], strides = [1, 1]} : vector<8x342xf32> to vector<8x288xf32>
    %66 = vector.extract_strided_slice %61 {offsets = [0, 19], sizes = [8, 288], strides = [1, 1]} : vector<8x342xf32> to vector<8x288xf32>
    %67 = vector.extract_strided_slice %61 {offsets = [0, 20], sizes = [8, 288], strides = [1, 1]} : vector<8x342xf32> to vector<8x288xf32>
    %68 = vector.extract_strided_slice %61 {offsets = [0, 36], sizes = [8, 288], strides = [1, 1]} : vector<8x342xf32> to vector<8x288xf32>
    %69 = vector.extract_strided_slice %61 {offsets = [0, 37], sizes = [8, 288], strides = [1, 1]} : vector<8x342xf32> to vector<8x288xf32>
    %70 = vector.extract_strided_slice %61 {offsets = [0, 38], sizes = [8, 288], strides = [1, 1]} : vector<8x342xf32> to vector<8x288xf32>
    %c0_38 = arith.constant 0 : index
    %c0_39 = arith.constant 0 : index
    %c0_40 = arith.constant 0 : index
    %71 = vector.load %arg4[%c0_38, %c0_39, %c0_40] : memref<9x8x8xf32, #tpu.memory_space<vmem>>, vector<1x8x8xf32>
    %72 = vector.shape_cast %71 : vector<1x8x8xf32> to vector<8x8xf32>
    %cst_41 = arith.constant dense<0.000000e+00> : vector<8x288xf32>
    %73 = tpu.matmul %72, %62, %cst_41 {dimension_numbers = #tpu.dot_dimension_numbers<[1], [0], [0], [1], [0, 0, 1, 1], [], []>} : vector<8x8xf32>, vector<8x288xf32>, vector<8x288xf32> -> vector<8x288xf32>
    %c1_42 = arith.constant 1 : index
    %c0_43 = arith.constant 0 : index
    %c0_44 = arith.constant 0 : index
    %74 = vector.load %arg4[%c1_42, %c0_43, %c0_44] : memref<9x8x8xf32, #tpu.memory_space<vmem>>, vector<1x8x8xf32>
    %75 = vector.shape_cast %74 : vector<1x8x8xf32> to vector<8x8xf32>
    %cst_45 = arith.constant dense<0.000000e+00> : vector<8x288xf32>
    %76 = tpu.matmul %75, %63, %cst_45 {dimension_numbers = #tpu.dot_dimension_numbers<[1], [0], [0], [1], [0, 0, 1, 1], [], []>} : vector<8x8xf32>, vector<8x288xf32>, vector<8x288xf32> -> vector<8x288xf32>
    %77 = arith.addf %73, %76 : vector<8x288xf32>
    %c2_46 = arith.constant 2 : index
    %c0_47 = arith.constant 0 : index
    %c0_48 = arith.constant 0 : index
    %78 = vector.load %arg4[%c2_46, %c0_47, %c0_48] : memref<9x8x8xf32, #tpu.memory_space<vmem>>, vector<1x8x8xf32>
    %79 = vector.shape_cast %78 : vector<1x8x8xf32> to vector<8x8xf32>
    %cst_49 = arith.constant dense<0.000000e+00> : vector<8x288xf32>
    %80 = tpu.matmul %79, %64, %cst_49 {dimension_numbers = #tpu.dot_dimension_numbers<[1], [0], [0], [1], [0, 0, 1, 1], [], []>} : vector<8x8xf32>, vector<8x288xf32>, vector<8x288xf32> -> vector<8x288xf32>
    %81 = arith.addf %77, %80 : vector<8x288xf32>
    %c3_50 = arith.constant 3 : index
    %c0_51 = arith.constant 0 : index
    %c0_52 = arith.constant 0 : index
    %82 = vector.load %arg4[%c3_50, %c0_51, %c0_52] : memref<9x8x8xf32, #tpu.memory_space<vmem>>, vector<1x8x8xf32>
    %83 = vector.shape_cast %82 : vector<1x8x8xf32> to vector<8x8xf32>
    %cst_53 = arith.constant dense<0.000000e+00> : vector<8x288xf32>
    %84 = tpu.matmul %83, %65, %cst_53 {dimension_numbers = #tpu.dot_dimension_numbers<[1], [0], [0], [1], [0, 0, 1, 1], [], []>} : vector<8x8xf32>, vector<8x288xf32>, vector<8x288xf32> -> vector<8x288xf32>
    %85 = arith.addf %81, %84 : vector<8x288xf32>
    %c4_54 = arith.constant 4 : index
    %c0_55 = arith.constant 0 : index
    %c0_56 = arith.constant 0 : index
    %86 = vector.load %arg4[%c4_54, %c0_55, %c0_56] : memref<9x8x8xf32, #tpu.memory_space<vmem>>, vector<1x8x8xf32>
    %87 = vector.shape_cast %86 : vector<1x8x8xf32> to vector<8x8xf32>
    %cst_57 = arith.constant dense<0.000000e+00> : vector<8x288xf32>
    %88 = tpu.matmul %87, %66, %cst_57 {dimension_numbers = #tpu.dot_dimension_numbers<[1], [0], [0], [1], [0, 0, 1, 1], [], []>} : vector<8x8xf32>, vector<8x288xf32>, vector<8x288xf32> -> vector<8x288xf32>
    %89 = arith.addf %85, %88 : vector<8x288xf32>
    %c5_58 = arith.constant 5 : index
    %c0_59 = arith.constant 0 : index
    %c0_60 = arith.constant 0 : index
    %90 = vector.load %arg4[%c5_58, %c0_59, %c0_60] : memref<9x8x8xf32, #tpu.memory_space<vmem>>, vector<1x8x8xf32>
    %91 = vector.shape_cast %90 : vector<1x8x8xf32> to vector<8x8xf32>
    %cst_61 = arith.constant dense<0.000000e+00> : vector<8x288xf32>
    %92 = tpu.matmul %91, %67, %cst_61 {dimension_numbers = #tpu.dot_dimension_numbers<[1], [0], [0], [1], [0, 0, 1, 1], [], []>} : vector<8x8xf32>, vector<8x288xf32>, vector<8x288xf32> -> vector<8x288xf32>
    %93 = arith.addf %89, %92 : vector<8x288xf32>
    %c6_62 = arith.constant 6 : index
    %c0_63 = arith.constant 0 : index
    %c0_64 = arith.constant 0 : index
    %94 = vector.load %arg4[%c6_62, %c0_63, %c0_64] : memref<9x8x8xf32, #tpu.memory_space<vmem>>, vector<1x8x8xf32>
    %95 = vector.shape_cast %94 : vector<1x8x8xf32> to vector<8x8xf32>
    %cst_65 = arith.constant dense<0.000000e+00> : vector<8x288xf32>
    %96 = tpu.matmul %95, %68, %cst_65 {dimension_numbers = #tpu.dot_dimension_numbers<[1], [0], [0], [1], [0, 0, 1, 1], [], []>} : vector<8x8xf32>, vector<8x288xf32>, vector<8x288xf32> -> vector<8x288xf32>
    %97 = arith.addf %93, %96 : vector<8x288xf32>
    %c7_66 = arith.constant 7 : index
    %c0_67 = arith.constant 0 : index
    %c0_68 = arith.constant 0 : index
    %98 = vector.load %arg4[%c7_66, %c0_67, %c0_68] : memref<9x8x8xf32, #tpu.memory_space<vmem>>, vector<1x8x8xf32>
    %99 = vector.shape_cast %98 : vector<1x8x8xf32> to vector<8x8xf32>
    %cst_69 = arith.constant dense<0.000000e+00> : vector<8x288xf32>
    %100 = tpu.matmul %99, %69, %cst_69 {dimension_numbers = #tpu.dot_dimension_numbers<[1], [0], [0], [1], [0, 0, 1, 1], [], []>} : vector<8x8xf32>, vector<8x288xf32>, vector<8x288xf32> -> vector<8x288xf32>
    %101 = arith.addf %97, %100 : vector<8x288xf32>
    %c8_70 = arith.constant 8 : index
    %c0_71 = arith.constant 0 : index
    %c0_72 = arith.constant 0 : index
    %102 = vector.load %arg4[%c8_70, %c0_71, %c0_72] : memref<9x8x8xf32, #tpu.memory_space<vmem>>, vector<1x8x8xf32>
    %103 = vector.shape_cast %102 : vector<1x8x8xf32> to vector<8x8xf32>
    %cst_73 = arith.constant dense<0.000000e+00> : vector<8x288xf32>
    %104 = tpu.matmul %103, %70, %cst_73 {dimension_numbers = #tpu.dot_dimension_numbers<[1], [0], [0], [1], [0, 0, 1, 1], [], []>} : vector<8x8xf32>, vector<8x288xf32>, vector<8x288xf32> -> vector<8x288xf32>
    %105 = arith.addf %101, %104 : vector<8x288xf32>
    %c0_74 = arith.constant 0 : index
    %c0_75 = arith.constant 0 : index
    %106 = vector.load %arg5[%c0_74, %c0_75] : memref<8x1xf32, #tpu.memory_space<vmem>>, vector<8x1xf32>
    %107 = vector.broadcast %106 : vector<8x1xf32> to vector<8x288xf32>
    %108 = arith.addf %105, %107 : vector<8x288xf32>
    %109 = arith.addf %108, %9 : vector<8x288xf32>
    %cst_76 = arith.constant 0.000000e+00 : f32
    %110 = vector.broadcast %cst_76 : f32 to vector<8x288xf32>
    %111 = arith.maximumf %109, %110 : vector<8x288xf32>
    %c0_77 = arith.constant 0 : index
    %c0_78 = arith.constant 0 : index
    %c0_79 = arith.constant 0 : index
    %112 = vector.load %arg6[%c0_77, %c0_78, %c0_79] : memref<2x8x288xf32, #tpu.memory_space<vmem>>, vector<1x8x288xf32>
    %113 = vector.shape_cast %112 : vector<1x8x288xf32> to vector<8x288xf32>
    %114 = vector.shape_cast %111 : vector<8x288xf32> to vector<1x8x288xf32>
    tpu.vector_store %arg6[%c0_77, %c0_78, %c0_79], %114 {strides = array<i32>} : memref<2x8x288xf32, #tpu.memory_space<vmem>>, vector<1x8x288xf32>,
    %c1_80 = arith.constant 1 : index
    %c0_81 = arith.constant 0 : index
    %c0_82 = arith.constant 0 : index
    %115 = vector.load %arg1[%c1_80, %c0_81, %c0_82] : memref<2x8x342xf32, #tpu.memory_space<vmem>>, vector<1x8x342xf32>
    %116 = vector.shape_cast %115 : vector<1x8x342xf32> to vector<8x342xf32>
    %117 = vector.extract_strided_slice %116 {offsets = [0, 0], sizes = [8, 288], strides = [1, 1]} : vector<8x342xf32> to vector<8x288xf32>
    %118 = vector.extract_strided_slice %116 {offsets = [0, 1], sizes = [8, 288], strides = [1, 1]} : vector<8x342xf32> to vector<8x288xf32>
    %119 = vector.extract_strided_slice %116 {offsets = [0, 2], sizes = [8, 288], strides = [1, 1]} : vector<8x342xf32> to vector<8x288xf32>
    %120 = vector.extract_strided_slice %116 {offsets = [0, 18], sizes = [8, 288], strides = [1, 1]} : vector<8x342xf32> to vector<8x288xf32>
    %121 = vector.extract_strided_slice %116 {offsets = [0, 19], sizes = [8, 288], strides = [1, 1]} : vector<8x342xf32> to vector<8x288xf32>
    %122 = vector.extract_strided_slice %116 {offsets = [0, 20], sizes = [8, 288], strides = [1, 1]} : vector<8x342xf32> to vector<8x288xf32>
    %123 = vector.extract_strided_slice %116 {offsets = [0, 36], sizes = [8, 288], strides = [1, 1]} : vector<8x342xf32> to vector<8x288xf32>
    %124 = vector.extract_strided_slice %116 {offsets = [0, 37], sizes = [8, 288], strides = [1, 1]} : vector<8x342xf32> to vector<8x288xf32>
    %125 = vector.extract_strided_slice %116 {offsets = [0, 38], sizes = [8, 288], strides = [1, 1]} : vector<8x342xf32> to vector<8x288xf32>
    %126 = vector.extract_strided_slice %121 {offsets = [7, 0], sizes = [1, 288], strides = [1, 1]} : vector<8x288xf32> to vector<1x288xf32>
    %c0_83 = arith.constant 0 : index
    %c0_84 = arith.constant 0 : index
    %c0_85 = arith.constant 0 : index
    %127 = vector.load %arg2[%c0_83, %c0_84, %c0_85] : memref<9x8x8xf32, #tpu.memory_space<vmem>>, vector<1x8x8xf32>
    %128 = vector.shape_cast %127 : vector<1x8x8xf32> to vector<8x8xf32>
    %cst_86 = arith.constant dense<0.000000e+00> : vector<8x288xf32>
    %129 = tpu.matmul %128, %117, %cst_86 {dimension_numbers = #tpu.dot_dimension_numbers<[1], [0], [0], [1], [0, 0, 1, 1], [], []>} : vector<8x8xf32>, vector<8x288xf32>, vector<8x288xf32> -> vector<8x288xf32>
    %c1_87 = arith.constant 1 : index
    %c0_88 = arith.constant 0 : index
    %c0_89 = arith.constant 0 : index
    %130 = vector.load %arg2[%c1_87, %c0_88, %c0_89] : memref<9x8x8xf32, #tpu.memory_space<vmem>>, vector<1x8x8xf32>
    %131 = vector.shape_cast %130 : vector<1x8x8xf32> to vector<8x8xf32>
    %cst_90 = arith.constant dense<0.000000e+00> : vector<8x288xf32>
    %132 = tpu.matmul %131, %118, %cst_90 {dimension_numbers = #tpu.dot_dimension_numbers<[1], [0], [0], [1], [0, 0, 1, 1], [], []>} : vector<8x8xf32>, vector<8x288xf32>, vector<8x288xf32> -> vector<8x288xf32>
    %133 = arith.addf %129, %132 : vector<8x288xf32>
    %c2_91 = arith.constant 2 : index
    %c0_92 = arith.constant 0 : index
    %c0_93 = arith.constant 0 : index
    %134 = vector.load %arg2[%c2_91, %c0_92, %c0_93] : memref<9x8x8xf32, #tpu.memory_space<vmem>>, vector<1x8x8xf32>
    %135 = vector.shape_cast %134 : vector<1x8x8xf32> to vector<8x8xf32>
    %cst_94 = arith.constant dense<0.000000e+00> : vector<8x288xf32>
    %136 = tpu.matmul %135, %119, %cst_94 {dimension_numbers = #tpu.dot_dimension_numbers<[1], [0], [0], [1], [0, 0, 1, 1], [], []>} : vector<8x8xf32>, vector<8x288xf32>, vector<8x288xf32> -> vector<8x288xf32>
    %137 = arith.addf %133, %136 : vector<8x288xf32>
    %c3_95 = arith.constant 3 : index
    %c0_96 = arith.constant 0 : index
    %c0_97 = arith.constant 0 : index
    %138 = vector.load %arg2[%c3_95, %c0_96, %c0_97] : memref<9x8x8xf32, #tpu.memory_space<vmem>>, vector<1x8x8xf32>
    %139 = vector.shape_cast %138 : vector<1x8x8xf32> to vector<8x8xf32>
    %cst_98 = arith.constant dense<0.000000e+00> : vector<8x288xf32>
    %140 = tpu.matmul %139, %120, %cst_98 {dimension_numbers = #tpu.dot_dimension_numbers<[1], [0], [0], [1], [0, 0, 1, 1], [], []>} : vector<8x8xf32>, vector<8x288xf32>, vector<8x288xf32> -> vector<8x288xf32>
    %141 = arith.addf %137, %140 : vector<8x288xf32>
    %c4_99 = arith.constant 4 : index
    %c0_100 = arith.constant 0 : index
    %c0_101 = arith.constant 0 : index
    %142 = vector.load %arg2[%c4_99, %c0_100, %c0_101] : memref<9x8x8xf32, #tpu.memory_space<vmem>>, vector<1x8x8xf32>
    %143 = vector.shape_cast %142 : vector<1x8x8xf32> to vector<8x8xf32>
    %cst_102 = arith.constant dense<0.000000e+00> : vector<8x288xf32>
    %144 = tpu.matmul %143, %121, %cst_102 {dimension_numbers = #tpu.dot_dimension_numbers<[1], [0], [0], [1], [0, 0, 1, 1], [], []>} : vector<8x8xf32>, vector<8x288xf32>, vector<8x288xf32> -> vector<8x288xf32>
    %145 = arith.addf %141, %144 : vector<8x288xf32>
    %c5_103 = arith.constant 5 : index
    %c0_104 = arith.constant 0 : index
    %c0_105 = arith.constant 0 : index
    %146 = vector.load %arg2[%c5_103, %c0_104, %c0_105] : memref<9x8x8xf32, #tpu.memory_space<vmem>>, vector<1x8x8xf32>
    %147 = vector.shape_cast %146 : vector<1x8x8xf32> to vector<8x8xf32>
    %cst_106 = arith.constant dense<0.000000e+00> : vector<8x288xf32>
    %148 = tpu.matmul %147, %122, %cst_106 {dimension_numbers = #tpu.dot_dimension_numbers<[1], [0], [0], [1], [0, 0, 1, 1], [], []>} : vector<8x8xf32>, vector<8x288xf32>, vector<8x288xf32> -> vector<8x288xf32>
    %149 = arith.addf %145, %148 : vector<8x288xf32>
    %c6_107 = arith.constant 6 : index
    %c0_108 = arith.constant 0 : index
    %c0_109 = arith.constant 0 : index
    %150 = vector.load %arg2[%c6_107, %c0_108, %c0_109] : memref<9x8x8xf32, #tpu.memory_space<vmem>>, vector<1x8x8xf32>
    %151 = vector.shape_cast %150 : vector<1x8x8xf32> to vector<8x8xf32>
    %cst_110 = arith.constant dense<0.000000e+00> : vector<8x288xf32>
    %152 = tpu.matmul %151, %123, %cst_110 {dimension_numbers = #tpu.dot_dimension_numbers<[1], [0], [0], [1], [0, 0, 1, 1], [], []>} : vector<8x8xf32>, vector<8x288xf32>, vector<8x288xf32> -> vector<8x288xf32>
    %153 = arith.addf %149, %152 : vector<8x288xf32>
    %c7_111 = arith.constant 7 : index
    %c0_112 = arith.constant 0 : index
    %c0_113 = arith.constant 0 : index
    %154 = vector.load %arg2[%c7_111, %c0_112, %c0_113] : memref<9x8x8xf32, #tpu.memory_space<vmem>>, vector<1x8x8xf32>
    %155 = vector.shape_cast %154 : vector<1x8x8xf32> to vector<8x8xf32>
    %cst_114 = arith.constant dense<0.000000e+00> : vector<8x288xf32>
    %156 = tpu.matmul %155, %124, %cst_114 {dimension_numbers = #tpu.dot_dimension_numbers<[1], [0], [0], [1], [0, 0, 1, 1], [], []>} : vector<8x8xf32>, vector<8x288xf32>, vector<8x288xf32> -> vector<8x288xf32>
    %157 = arith.addf %153, %156 : vector<8x288xf32>
    %c8_115 = arith.constant 8 : index
    %c0_116 = arith.constant 0 : index
    %c0_117 = arith.constant 0 : index
    %158 = vector.load %arg2[%c8_115, %c0_116, %c0_117] : memref<9x8x8xf32, #tpu.memory_space<vmem>>, vector<1x8x8xf32>
    %159 = vector.shape_cast %158 : vector<1x8x8xf32> to vector<8x8xf32>
    %cst_118 = arith.constant dense<0.000000e+00> : vector<8x288xf32>
    %160 = tpu.matmul %159, %125, %cst_118 {dimension_numbers = #tpu.dot_dimension_numbers<[1], [0], [0], [1], [0, 0, 1, 1], [], []>} : vector<8x8xf32>, vector<8x288xf32>, vector<8x288xf32> -> vector<8x288xf32>
    %161 = arith.addf %157, %160 : vector<8x288xf32>
    %c0_119 = arith.constant 0 : index
    %c0_120 = arith.constant 0 : index
    %162 = vector.load %arg3[%c0_119, %c0_120] : memref<8x1xf32, #tpu.memory_space<vmem>>, vector<8x1xf32>
    %163 = vector.broadcast %162 : vector<8x1xf32> to vector<8x288xf32>
    %164 = arith.addf %161, %163 : vector<8x288xf32>
    %cst_121 = arith.constant 0.000000e+00 : f32
    %165 = vector.broadcast %cst_121 : f32 to vector<8x288xf32>
    %166 = arith.maximumf %164, %165 : vector<8x288xf32>
    %167 = vector.broadcast %126 : vector<1x288xf32> to vector<8x288xf32>
    %168 = arith.mulf %166, %167 : vector<8x288xf32>
    %c1_122 = arith.constant 1 : index
    %c0_123 = arith.constant 0 : index
    %c19_124 = arith.constant 19 : index
    %169 = vector.load %arg7[%c1_122, %c0_123, %c19_124] : memref<2x8x342xf32, #tpu.memory_space<vmem>>, vector<1x8x288xf32>
    %170 = vector.shape_cast %169 : vector<1x8x288xf32> to vector<8x288xf32>
    %171 = vector.shape_cast %168 : vector<8x288xf32> to vector<1x8x288xf32>
    tpu.vector_store %arg7[%c1_122, %c0_123, %c19_124], %171 {strides = array<i32>} : memref<2x8x342xf32, #tpu.memory_space<vmem>>, vector<1x8x288xf32>,
    %c1_125 = arith.constant 1 : index
    %c0_126 = arith.constant 0 : index
    %c0_127 = arith.constant 0 : index
    %172 = vector.load %arg7[%c1_125, %c0_126, %c0_127] : memref<2x8x342xf32, #tpu.memory_space<vmem>>, vector<1x8x342xf32>
    %173 = vector.shape_cast %172 : vector<1x8x342xf32> to vector<8x342xf32>
    %174 = vector.extract_strided_slice %173 {offsets = [0, 0], sizes = [8, 288], strides = [1, 1]} : vector<8x342xf32> to vector<8x288xf32>
    %175 = vector.extract_strided_slice %173 {offsets = [0, 1], sizes = [8, 288], strides = [1, 1]} : vector<8x342xf32> to vector<8x288xf32>
    %176 = vector.extract_strided_slice %173 {offsets = [0, 2], sizes = [8, 288], strides = [1, 1]} : vector<8x342xf32> to vector<8x288xf32>
    %177 = vector.extract_strided_slice %173 {offsets = [0, 18], sizes = [8, 288], strides = [1, 1]} : vector<8x342xf32> to vector<8x288xf32>
    %178 = vector.extract_strided_slice %173 {offsets = [0, 19], sizes = [8, 288], strides = [1, 1]} : vector<8x342xf32> to vector<8x288xf32>
    %179 = vector.extract_strided_slice %173 {offsets = [0, 20], sizes = [8, 288], strides = [1, 1]} : vector<8x342xf32> to vector<8x288xf32>
    %180 = vector.extract_strided_slice %173 {offsets = [0, 36], sizes = [8, 288], strides = [1, 1]} : vector<8x342xf32> to vector<8x288xf32>
    %181 = vector.extract_strided_slice %173 {offsets = [0, 37], sizes = [8, 288], strides = [1, 1]} : vector<8x342xf32> to vector<8x288xf32>
    %182 = vector.extract_strided_slice %173 {offsets = [0, 38], sizes = [8, 288], strides = [1, 1]} : vector<8x342xf32> to vector<8x288xf32>
    %c0_128 = arith.constant 0 : index
    %c0_129 = arith.constant 0 : index
    %c0_130 = arith.constant 0 : index
    %183 = vector.load %arg4[%c0_128, %c0_129, %c0_130] : memref<9x8x8xf32, #tpu.memory_space<vmem>>, vector<1x8x8xf32>
    %184 = vector.shape_cast %183 : vector<1x8x8xf32> to vector<8x8xf32>
    %cst_131 = arith.constant dense<0.000000e+00> : vector<8x288xf32>
    %185 = tpu.matmul %184, %174, %cst_131 {dimension_numbers = #tpu.dot_dimension_numbers<[1], [0], [0], [1], [0, 0, 1, 1], [], []>} : vector<8x8xf32>, vector<8x288xf32>, vector<8x288xf32> -> vector<8x288xf32>
    %c1_132 = arith.constant 1 : index
    %c0_133 = arith.constant 0 : index
    %c0_134 = arith.constant 0 : index
    %186 = vector.load %arg4[%c1_132, %c0_133, %c0_134] : memref<9x8x8xf32, #tpu.memory_space<vmem>>, vector<1x8x8xf32>
    %187 = vector.shape_cast %186 : vector<1x8x8xf32> to vector<8x8xf32>
    %cst_135 = arith.constant dense<0.000000e+00> : vector<8x288xf32>
    %188 = tpu.matmul %187, %175, %cst_135 {dimension_numbers = #tpu.dot_dimension_numbers<[1], [0], [0], [1], [0, 0, 1, 1], [], []>} : vector<8x8xf32>, vector<8x288xf32>, vector<8x288xf32> -> vector<8x288xf32>
    %189 = arith.addf %185, %188 : vector<8x288xf32>
    %c2_136 = arith.constant 2 : index
    %c0_137 = arith.constant 0 : index
    %c0_138 = arith.constant 0 : index
    %190 = vector.load %arg4[%c2_136, %c0_137, %c0_138] : memref<9x8x8xf32, #tpu.memory_space<vmem>>, vector<1x8x8xf32>
    %191 = vector.shape_cast %190 : vector<1x8x8xf32> to vector<8x8xf32>
    %cst_139 = arith.constant dense<0.000000e+00> : vector<8x288xf32>
    %192 = tpu.matmul %191, %176, %cst_139 {dimension_numbers = #tpu.dot_dimension_numbers<[1], [0], [0], [1], [0, 0, 1, 1], [], []>} : vector<8x8xf32>, vector<8x288xf32>, vector<8x288xf32> -> vector<8x288xf32>
    %193 = arith.addf %189, %192 : vector<8x288xf32>
    %c3_140 = arith.constant 3 : index
    %c0_141 = arith.constant 0 : index
    %c0_142 = arith.constant 0 : index
    %194 = vector.load %arg4[%c3_140, %c0_141, %c0_142] : memref<9x8x8xf32, #tpu.memory_space<vmem>>, vector<1x8x8xf32>
    %195 = vector.shape_cast %194 : vector<1x8x8xf32> to vector<8x8xf32>
    %cst_143 = arith.constant dense<0.000000e+00> : vector<8x288xf32>
    %196 = tpu.matmul %195, %177, %cst_143 {dimension_numbers = #tpu.dot_dimension_numbers<[1], [0], [0], [1], [0, 0, 1, 1], [], []>} : vector<8x8xf32>, vector<8x288xf32>, vector<8x288xf32> -> vector<8x288xf32>
    %197 = arith.addf %193, %196 : vector<8x288xf32>
    %c4_144 = arith.constant 4 : index
    %c0_145 = arith.constant 0 : index
    %c0_146 = arith.constant 0 : index
    %198 = vector.load %arg4[%c4_144, %c0_145, %c0_146] : memref<9x8x8xf32, #tpu.memory_space<vmem>>, vector<1x8x8xf32>
    %199 = vector.shape_cast %198 : vector<1x8x8xf32> to vector<8x8xf32>
    %cst_147 = arith.constant dense<0.000000e+00> : vector<8x288xf32>
    %200 = tpu.matmul %199, %178, %cst_147 {dimension_numbers = #tpu.dot_dimension_numbers<[1], [0], [0], [1], [0, 0, 1, 1], [], []>} : vector<8x8xf32>, vector<8x288xf32>, vector<8x288xf32> -> vector<8x288xf32>
    %201 = arith.addf %197, %200 : vector<8x288xf32>
    %c5_148 = arith.constant 5 : index
    %c0_149 = arith.constant 0 : index
    %c0_150 = arith.constant 0 : index
    %202 = vector.load %arg4[%c5_148, %c0_149, %c0_150] : memref<9x8x8xf32, #tpu.memory_space<vmem>>, vector<1x8x8xf32>
    %203 = vector.shape_cast %202 : vector<1x8x8xf32> to vector<8x8xf32>
    %cst_151 = arith.constant dense<0.000000e+00> : vector<8x288xf32>
    %204 = tpu.matmul %203, %179, %cst_151 {dimension_numbers = #tpu.dot_dimension_numbers<[1], [0], [0], [1], [0, 0, 1, 1], [], []>} : vector<8x8xf32>, vector<8x288xf32>, vector<8x288xf32> -> vector<8x288xf32>
    %205 = arith.addf %201, %204 : vector<8x288xf32>
    %c6_152 = arith.constant 6 : index
    %c0_153 = arith.constant 0 : index
    %c0_154 = arith.constant 0 : index
    %206 = vector.load %arg4[%c6_152, %c0_153, %c0_154] : memref<9x8x8xf32, #tpu.memory_space<vmem>>, vector<1x8x8xf32>
    %207 = vector.shape_cast %206 : vector<1x8x8xf32> to vector<8x8xf32>
    %cst_155 = arith.constant dense<0.000000e+00> : vector<8x288xf32>
    %208 = tpu.matmul %207, %180, %cst_155 {dimension_numbers = #tpu.dot_dimension_numbers<[1], [0], [0], [1], [0, 0, 1, 1], [], []>} : vector<8x8xf32>, vector<8x288xf32>, vector<8x288xf32> -> vector<8x288xf32>
    %209 = arith.addf %205, %208 : vector<8x288xf32>
    %c7_156 = arith.constant 7 : index
    %c0_157 = arith.constant 0 : index
    %c0_158 = arith.constant 0 : index
    %210 = vector.load %arg4[%c7_156, %c0_157, %c0_158] : memref<9x8x8xf32, #tpu.memory_space<vmem>>, vector<1x8x8xf32>
    %211 = vector.shape_cast %210 : vector<1x8x8xf32> to vector<8x8xf32>
    %cst_159 = arith.constant dense<0.000000e+00> : vector<8x288xf32>
    %212 = tpu.matmul %211, %181, %cst_159 {dimension_numbers = #tpu.dot_dimension_numbers<[1], [0], [0], [1], [0, 0, 1, 1], [], []>} : vector<8x8xf32>, vector<8x288xf32>, vector<8x288xf32> -> vector<8x288xf32>
    %213 = arith.addf %209, %212 : vector<8x288xf32>
    %c8_160 = arith.constant 8 : index
    %c0_161 = arith.constant 0 : index
    %c0_162 = arith.constant 0 : index
    %214 = vector.load %arg4[%c8_160, %c0_161, %c0_162] : memref<9x8x8xf32, #tpu.memory_space<vmem>>, vector<1x8x8xf32>
    %215 = vector.shape_cast %214 : vector<1x8x8xf32> to vector<8x8xf32>
    %cst_163 = arith.constant dense<0.000000e+00> : vector<8x288xf32>
    %216 = tpu.matmul %215, %182, %cst_163 {dimension_numbers = #tpu.dot_dimension_numbers<[1], [0], [0], [1], [0, 0, 1, 1], [], []>} : vector<8x8xf32>, vector<8x288xf32>, vector<8x288xf32> -> vector<8x288xf32>
    %217 = arith.addf %213, %216 : vector<8x288xf32>
    %c0_164 = arith.constant 0 : index
    %c0_165 = arith.constant 0 : index
    %218 = vector.load %arg5[%c0_164, %c0_165] : memref<8x1xf32, #tpu.memory_space<vmem>>, vector<8x1xf32>
    %219 = vector.broadcast %218 : vector<8x1xf32> to vector<8x288xf32>
    %220 = arith.addf %217, %219 : vector<8x288xf32>
    %221 = arith.addf %220, %121 : vector<8x288xf32>
    %cst_166 = arith.constant 0.000000e+00 : f32
    %222 = vector.broadcast %cst_166 : f32 to vector<8x288xf32>
    %223 = arith.maximumf %221, %222 : vector<8x288xf32>
    %c1_167 = arith.constant 1 : index
    %c0_168 = arith.constant 0 : index
    %c0_169 = arith.constant 0 : index
    %224 = vector.load %arg6[%c1_167, %c0_168, %c0_169] : memref<2x8x288xf32, #tpu.memory_space<vmem>>, vector<1x8x288xf32>
    %225 = vector.shape_cast %224 : vector<1x8x288xf32> to vector<8x288xf32>
    %226 = vector.shape_cast %223 : vector<8x288xf32> to vector<1x8x288xf32>
    tpu.vector_store %arg6[%c1_167, %c0_168, %c0_169], %226 {strides = array<i32>} : memref<2x8x288xf32, #tpu.memory_space<vmem>>, vector<1x8x288xf32>,
    return
  }
  func.func @transform_0(%arg0: i32) -> (i32, i32, i32) {
    %c0_i32 = arith.constant 0 : i32
    %c0_i32_0 = arith.constant 0 : i32
    %c0_i32_1 = arith.constant 0 : i32
    return %arg0, %c0_i32, %c0_i32_0 : i32, i32, i32
  }
  func.func @transform_1(%arg0: i32) -> (i32, i32, i32) {
    %c0_i32 = arith.constant 0 : i32
    %c0_i32_0 = arith.constant 0 : i32
    %c0_i32_1 = arith.constant 0 : i32
    %c0_i32_2 = arith.constant 0 : i32
    return %c0_i32, %c0_i32_0, %c0_i32_1 : i32, i32, i32
  }
  func.func @transform_2(%arg0: i32) -> (i32, i32) {
    %c0_i32 = arith.constant 0 : i32
    %c0_i32_0 = arith.constant 0 : i32
    %c0_i32_1 = arith.constant 0 : i32
    return %c0_i32, %c0_i32_0 : i32, i32
  }
  func.func @transform_3(%arg0: i32) -> (i32, i32, i32) {
    %c0_i32 = arith.constant 0 : i32
    %c0_i32_0 = arith.constant 0 : i32
    %c0_i32_1 = arith.constant 0 : i32
    %c0_i32_2 = arith.constant 0 : i32
    return %c0_i32, %c0_i32_0, %c0_i32_1 : i32, i32, i32
  }
  func.func @transform_4(%arg0: i32) -> (i32, i32) {
    %c0_i32 = arith.constant 0 : i32
    %c0_i32_0 = arith.constant 0 : i32
    %c0_i32_1 = arith.constant 0 : i32
    return %c0_i32, %c0_i32_0 : i32, i32
  }
  func.func @transform_5(%arg0: i32) -> (i32, i32, i32) {
    %c0_i32 = arith.constant 0 : i32
    %c0_i32_0 = arith.constant 0 : i32
    %c0_i32_1 = arith.constant 0 : i32
    return %arg0, %c0_i32, %c0_i32_0 : i32, i32, i32
  }
}

</mosaic_0001>

<bundles_post_ra>
// kernel: tpu_custom_call.1
= control target key start
LH: loop header
LB: loop body
LE: loop exit
PB: predicated region body
PF: predicated region fallthrough
CT: control target
= control target key end

     0   :  { %s6311_s22 = smov 127   ;;  %v6312_v2 = vmov 0.0   ;;  %vm6313_vm0 = vmmov 0   ;;  %s7142_s0 = inlined_call_operand.vmem [shape: f32[2,8,342], index: 0, kind: input, shape index: {}]   ;;  %s7143_s1 = inlined_call_operand.vmem [shape: f32[9,8,8], index: 1, kind: input, shape index: {}]   ;;  %s7144_s2 = inlined_call_operand.vmem [shape: f32[8,1], index: 2, kind: input, shape index: {}]   ;;  %s7145_s3 = inlined_call_operand.vmem [shape: f32[9,8,8], index: 3, kind: input, shape index: {}]   ;;  %s7146_s4 = inlined_call_operand.vmem [shape: f32[8,1], index: 4, kind: input, shape index: {}]   ;;  %s7147_s5 = inlined_call_operand.hbm [shape: f32[2,8,288], index: 5, kind: output, shape index: {}]  }
   0x1   :  { %v6359_v0 = vld [vmem:[%s7142_s0 + $0x8] sm:$0xff]  ;;  %v6364_v1 = vld [vmem:[%s7142_s0] sm:$0xff]  ;;  %25 = vst [vmem:[#allocation2] sm:$0xff] %v6312_v2  ;;  %29 = vst [vmem:[#allocation2 + $0x18] sm:$0xff] %v6312_v2  ;;  %6091 = vmatprep.subr.mxu1 %v6312_v2  ;;  %6093 = vmatprep.mubr.msk.f32.mxu1 %vm6313_vm0, %v6312_v2 }
   0x2   :  { %43 = vrot.lane.b32.xlu0 %v6359_v0, %s6311_s22  ;;  %41 = vrot.lane.b32.xlu1 %v6364_v1, %s6311_s22  ;;  %v6375_v3 = vld [vmem:[%s7142_s0 + $0x10] sm:$0xff] }
   0x3   :  { %121 = vmatprep.mubr.f32.mxu0 %v6312_v2 }
   0x4   :  { %10 = vsyncpa [#allocation4], 0  ;;  %s6314_s25 = smov 126   ;;  %s6315_s26 = smov 110   ;;  %v1481_v4 = vlaneseq  ;;  %v6319_v5 = vmov 0   ;;  %v6432_v9 = vld [vmem:[%s7144_s2] sm:$0xff] }
   0x5   :  { %s6316_s27 = smov 109   ;;  %s6317_s28 = smov 108   ;;  %6286 = vset.pattern.permute.xlu0 %v6319_v5  ;;  %6287 = vset.pattern.permute.xlu1 %v6319_v5  ;;  %vm47_vm1 = vcmask 1039360   ;;  %v6445_v14 = vld [vmem:[%s7143_s1 + $0x8] sm:$0xff]  ;;  %vm53_vm2 = vcmask 64512   ;;  %vm350_vm3 = vcmask 1031168  }
   0x6   :  { %45 = vrot.lane.b32.xlu0 %v6375_v3, %s6311_s22  ;;  %346 = vrot.lane.b32.xlu1 %v6359_v0, %s6314_s25  ;;  %s6318_s29 = smov 92   ;;  %s6320_s30 = smov 91   ;;  %v1482_v6 = vshrl.u32 %v1481_v4, 7  ;;  %v6458_v21 = vld [vmem:[%s7143_s1] sm:$0xff]  ;;  %vm511_vm4 = vcmask 900096   ;;  %v6472_v25 = vld [vmem:[%s7143_s1 + $0x10] sm:$0xff] }
   0x7   :  { %s6321_s6 = smov 90   ;;  %v6487_v30 = vld [vmem:[%s7143_s1 + $0x18] sm:$0xff]  ;;  %vm672_vm5 = vcmask 891904   ;;  %v6517_v36 = vld [vmem:[%s7143_s1 + $0x20] sm:$0xff]  ;;  %vm833_vm6 = vcmask 883712   ;;  %v6530_v40 = vld [vmem:[%s7143_s1 + $0x28] sm:$0xff] }
   0x8   :  { %v6421_v7 = vsub.s32 7, %v1482_v6  ;;  %vm994_vm7 = vcmask 752640   ;;  %v6548_v48 = vld [vmem:[%s7143_s1 + $0x30] sm:$0xff]  ;;  %vm1155_vm8 = vcmask 744448   ;;  %v6560_v51 = vld [vmem:[%s7143_s1 + $0x38] sm:$0xff]  ;;  %vm1316_vm9 = vcmask 736256  }
   0x9   :  { %v6575_v56 = vld [vmem:[%s7143_s1 + $0x40] sm:$0xff]  ;;  %vm27_vm10 = vcmask 703488   ;;  %s6322_s1 = smov 19   ;;  %vm1525_vm11 = vcmask 1047704   ;;  %vm1519_vm12 = vcmask 154624   ;;  %vm1528_vm13 = vcmask 416768  }
   0xa   :  { %348 = vrot.lane.b32.xlu0 %v6375_v3, %s6314_s25  ;;  %344 = vrot.lane.b32.xlu1 %v6364_v1, %s6314_s25  ;;  %v1484_v8 = vrot.slane %v6364_v1, %v6421_v7  ;;  %v1488_v10 = vrot.slane %v6359_v0, %v6421_v7  ;;  %v1492_v11 = vrot.slane %v6375_v3, %v6421_v7  ;;  %vm2975_vm14 = vcmask 261120  }
   0xb   :  { %28 = vst.msk [vmem:[#allocation2 + $0x10] sm:$0xff] %vm27_vm10, %v6312_v2  ;;  %31 = vst.msk [vmem:[#allocation2 + $0x28] sm:$0xff] %vm27_vm10, %v6312_v2 }
   0xe   :  { %507 = vrot.lane.b32.xlu0 %v6359_v0, %s6315_s26  ;;  %509 = vrot.lane.b32.xlu1 %v6375_v3, %s6315_s26 }
  0x12   :  { %505 = vrot.lane.b32.xlu0 %v6364_v1, %s6315_s26  ;;  %668 = vrot.lane.b32.xlu1 %v6359_v0, %s6316_s27 }
  0x16   :  { %670 = vrot.lane.b32.xlu0 %v6375_v3, %s6316_s27  ;;  %666 = vrot.lane.b32.xlu1 %v6364_v1, %s6316_s27 }
  0x1a   :  { %829 = vrot.lane.b32.xlu0 %v6359_v0, %s6317_s28  ;;  %831 = vrot.lane.b32.xlu1 %v6375_v3, %s6317_s28 }
  0x1e   :  { %827 = vrot.lane.b32.xlu0 %v6364_v1, %s6317_s28  ;;  %990 = vrot.lane.b32.xlu1 %v6359_v0, %s6318_s29 }
  0x22   :  { %992 = vrot.lane.b32.xlu0 %v6375_v3, %s6318_s29  ;;  %988 = vrot.lane.b32.xlu1 %v6364_v1, %s6318_s29 }
  0x26   :  { %1151 = vrot.lane.b32.xlu0 %v6359_v0, %s6320_s30  ;;  %1153 = vrot.lane.b32.xlu1 %v6375_v3, %s6320_s30 }
  0x2a   :  { %1149 = vrot.lane.b32.xlu0 %v6364_v1, %s6320_s30  ;;  %1312 = vrot.lane.b32.xlu1 %v6359_v0, %s6321_s6 }
  0x2e   :  { %1314 = vrot.lane.b32.xlu0 %v6375_v3, %s6321_s6  ;;  %1310 = vrot.lane.b32.xlu1 %v6364_v1, %s6321_s6 }
  0x32   :  { %1472 = vperm.xlu0 %6286, %v6432_v9   ;;  %1496 = vrot.lane.b32.xlu1 %v1484_v8, %s6316_s27 }
  0x36   :  { %1498 = vrot.lane.b32.xlu1 %v1488_v10, %s6316_s27  ;;  %1500 = vrot.lane.b32.xlu0 %v1492_v11, %s6316_s27 }
  0x74   :  { %v44_v12 = vpop.permute.xlu0 %43  ;;  %v42_v13 = vpop.permute.xlu1 %41 }
  0x75   :  { %v48_v18 = vsel %vm47_vm1, %v42_v13, %v44_v12 }
  0x78   :  { %v46_v15 = vpop.permute.xlu0 %45  ;;  %v347_v16 = vpop.permute.xlu1 %346 }
  0x79   :  { %6092 = vmatpush3.msra.mxu1 %v46_v15  ;;  %v49_v17 = vsel %vm47_vm1, %v44_v12, %v46_v15 }
  0x7a   :  { %87 = vmatprep.subr.mxu0 %v49_v17  ;;  %6094 = vmatmul.mubr.msk.f32.vlgmr.msra.gmra.mxu1 %vm53_vm2, %v6445_v14 }
  0x7b   :  { %88 = vmatpush1.msra.mxu0 %v48_v18  ;;  %6096 = vmatprep.subr.mxu1 %v6312_v2 }
  0x7c   :  { %v349_v19 = vpop.permute.xlu0 %348  ;;  %231 = vmatprep.subr.mxu0 %v6359_v0  ;;  %v345_v20 = vpop.permute.xlu1 %344  ;;  %5913 = vmatmul.mubr.msk.f32.vlgmr.msra.gmra.mxu0 %vm53_vm2, %v6445_v14 }
  0x7d   :  { %6097 = vmatpush3.msra.mxu1 %v6375_v3  ;;  %232 = vmatpush1.msra.mxu0 %v6364_v1  ;;  %v352_v22 = vsel %vm350_vm3, %v347_v16, %v349_v19  ;;  %v351_v26 = vsel %vm350_vm3, %v345_v20, %v347_v16 }
  0x7e   :  { %6098 = vmatprep.mubr.msk.f32.mxu1 %vm6313_vm0, %v6312_v2  ;;  %6101 = vmatprep.subr.mxu1 %v6312_v2 }
  0x7f   :  { %6099 = vmatmul.mubr.msk.f32.vlgmr.msra.gmra.mxu1 %vm53_vm2, %v6458_v21  ;;  %389 = vmatprep.subr.mxu0 %v352_v22 }
  0x80   :  { %6102 = vmatpush3.msra.mxu1 %v349_v19  ;;  %265 = vmatprep.mubr.f32.mxu0 %v6312_v2  ;;  %v508_v23 = vpop.permute.xlu0 %507  ;;  %v510_v24 = vpop.permute.xlu1 %509 }
  0x81   :  { %5915 = vmatmul.mubr.msk.f32.vlgmr.msra.gmra.mxu0 %vm53_vm2, %v6458_v21  ;;  %6103 = vmatprep.mubr.msk.f32.mxu1 %vm6313_vm0, %v6312_v2  ;;  %v513_v27 = vsel %vm511_vm4, %v508_v23, %v510_v24 }
  0x82   :  { %390 = vmatpush1.msra.mxu0 %v351_v26  ;;  %6106 = vmatprep.subr.mxu1 %v6312_v2 }
  0x83   :  { %6104 = vmatmul.mubr.msk.f32.vlgmr.msra.gmra.mxu1 %vm53_vm2, %v6472_v25  ;;  %550 = vmatprep.subr.mxu0 %v513_v27 }
  0x84   :  { %6107 = vmatpush3.msra.mxu1 %v510_v24  ;;  %423 = vmatprep.mubr.f32.mxu0 %v6312_v2  ;;  %v506_v28 = vpop.permute.xlu0 %505  ;;  %v669_v29 = vpop.permute.xlu1 %668 }
  0x85   :  { %v512_v31 = vsel %vm511_vm4, %v506_v28, %v508_v23  ;;  %5918 = vmatmul.mubr.msk.f32.vlgmr.msra.gmra.mxu0 %vm53_vm2, %v6472_v25  ;;  %6108 = vmatprep.mubr.msk.f32.mxu1 %vm6313_vm0, %v6312_v2 }
  0x86   :  { %551 = vmatpush1.msra.mxu0 %v512_v31  ;;  %584 = vmatprep.mubr.f32.mxu0 %v6312_v2 }
  0x87   :  { %6111 = vmatprep.subr.mxu1 %v6312_v2  ;;  %6109 = vmatmul.mubr.msk.f32.vlgmr.msra.gmra.mxu1 %vm53_vm2, %v6487_v30 }
  0x88   :  { %v6498_v32 = vpop.permute.xlu0 %670  ;;  %v667_v33 = vpop.permute.xlu1 %666  ;;  %6113 = vmatprep.mubr.msk.f32.mxu1 %vm6313_vm0, %v6312_v2 }
  0x89   :  { %v6503_v34 = vsel %vm672_vm5, %v667_v33, %v669_v29  ;;  %5921 = vmatmul.mubr.msk.f32.vlgmr.msra.gmra.mxu0 %vm53_vm2, %v6487_v30  ;;  %6112 = vmatpush3.msra.mxu1 %v6498_v32  ;;  %v6510_v35 = vsel %vm672_vm5, %v669_v29, %v6498_v32 }
  0x8a   :  { %711 = vmatprep.subr.mxu0 %v6510_v35  ;;  %745 = vmatprep.mubr.f32.mxu0 %v6312_v2 }
  0x8b   :  { %712 = vmatpush1.msra.mxu0 %v6503_v34  ;;  %6116 = vmatprep.subr.mxu1 %v6312_v2 }
  0x8c   :  { %v830_v37 = vpop.permute.xlu0 %829  ;;  %v832_v38 = vpop.permute.xlu1 %831  ;;  %6114 = vmatmul.mubr.msk.f32.vlgmr.msra.gmra.mxu1 %vm53_vm2, %v6517_v36 }
  0x8d   :  { %5924 = vmatmul.mubr.msk.f32.vlgmr.msra.gmra.mxu0 %vm53_vm2, %v6517_v36  ;;  %v835_v39 = vsel %vm833_vm6, %v830_v37, %v832_v38  ;;  %6117 = vmatpush3.msra.mxu1 %v832_v38 }
  0x8e   :  { %872 = vmatprep.subr.mxu0 %v835_v39  ;;  %906 = vmatprep.mubr.f32.mxu0 %v6312_v2 }
  0x8f   :  { %6118 = vmatprep.mubr.msk.f32.mxu1 %vm6313_vm0, %v6312_v2  ;;  %6121 = vmatprep.subr.mxu1 %v6312_v2 }
  0x90   :  { %v828_v41 = vpop.permute.xlu0 %827  ;;  %v991_v42 = vpop.permute.xlu1 %990  ;;  %6119 = vmatmul.mubr.msk.f32.vlgmr.msra.gmra.mxu1 %vm53_vm2, %v6530_v40 }
  0x91   :  { %v834_v43 = vsel %vm833_vm6, %v828_v41, %v830_v37  ;;  %6123 = vmatprep.mubr.msk.f32.mxu1 %vm6313_vm0, %v6312_v2 }
  0x92   :  { %873 = vmatpush1.msra.mxu0 %v834_v43 }
  0x93   :  { %5927 = vmatmul.mubr.msk.f32.vlgmr.msra.gmra.mxu0 %vm53_vm2, %v6530_v40 }
  0x94   :  { %v993_v44 = vpop.permute.xlu0 %992  ;;  %v989_v45 = vpop.permute.xlu1 %988  ;;  %1067 = vmatprep.mubr.f32.mxu0 %v6312_v2 }
  0x95   :  { %v995_v46 = vsel %vm994_vm7, %v989_v45, %v991_v42  ;;  %6122 = vmatpush3.msra.mxu1 %v993_v44  ;;  %v996_v47 = vsel %vm994_vm7, %v991_v42, %v993_v44 }
  0x96   :  { %1033 = vmatprep.subr.mxu0 %v996_v47  ;;  %6126 = vmatprep.subr.mxu1 %v6312_v2 }
  0x97   :  { %1034 = vmatpush1.msra.mxu0 %v995_v46  ;;  %6124 = vmatmul.mubr.msk.f32.vlgmr.msra.gmra.mxu1 %vm53_vm2, %v6548_v48 }
  0x98   :  { %v1152_v49 = vpop.permute.xlu0 %1151  ;;  %v1154_v50 = vpop.permute.xlu1 %1153  ;;  %5930 = vmatmul.mubr.msk.f32.vlgmr.msra.gmra.mxu0 %vm53_vm2, %v6548_v48  ;;  %6128 = vmatprep.mubr.msk.f32.mxu1 %vm6313_vm0, %v6312_v2 }
  0x99   :  { %v1157_v52 = vsel %vm1155_vm8, %v1152_v49, %v1154_v50  ;;  %6127 = vmatpush3.msra.mxu1 %v1154_v50  ;;  %1228 = vmatprep.mubr.f32.mxu0 %v6312_v2 }
  0x9a   :  { %1194 = vmatprep.subr.mxu0 %v1157_v52  ;;  %6131 = vmatprep.subr.mxu1 %v6312_v2 }
  0x9b   :  { %6129 = vmatmul.mubr.msk.f32.vlgmr.msra.gmra.mxu1 %vm53_vm2, %v6560_v51 }
  0x9c   :  { %v1150_v53 = vpop.permute.xlu0 %1149  ;;  %v1313_v54 = vpop.permute.xlu1 %1312  ;;  %6133 = vmatprep.mubr.msk.f32.mxu1 %vm6313_vm0, %v6312_v2 }
  0x9d   :  { %v1156_v55 = vsel %vm1155_vm8, %v1150_v53, %v1152_v49 }
  0x9e   :  { %1195 = vmatpush1.msra.mxu0 %v1156_v55 }
  0x9f   :  { %5933 = vmatmul.mubr.msk.f32.vlgmr.msra.gmra.mxu0 %vm53_vm2, %v6560_v51 }
  0xa0   :  { %v1315_v57 = vpop.permute.xlu0 %1314  ;;  %v1311_v58 = vpop.permute.xlu1 %1310  ;;  %1389 = vmatprep.mubr.f32.mxu0 %v6312_v2 }
  0xa1   :  { %v1317_v59 = vsel %vm1316_vm9, %v1311_v58, %v1313_v54  ;;  %6132 = vmatpush3.msra.mxu1 %v1315_v57  ;;  %v1318_v60 = vsel %vm1316_vm9, %v1313_v54, %v1315_v57 }
  0xa2   :  { %1355 = vmatprep.subr.mxu0 %v1318_v60  ;;  %6134 = vmatmul.mubr.msk.f32.vlgmr.msra.gmra.mxu1 %vm53_vm2, %v6575_v56 }
  0xa3   :  { %1356 = vmatpush1.msra.mxu0 %v1317_v59  ;;  %6136 = vmatprep.subr.mxu1 %v6312_v2 }
  0xa4   :  { %5936 = vmatmul.mubr.msk.f32.vlgmr.msra.gmra.mxu0 %vm53_vm2, %v6575_v56  ;;  %6138 = vmatprep.mubr.msk.f32.mxu1 %vm6313_vm0, %v6312_v2 }
  0xa5   :  { %1617 = vmatprep.mubr.f32.mxu0 %v6312_v2 }
 0x13a   :  { %v194_v61 = vpop.f32.mrf.mxu1 }
 0x13c   :  { %v123_v62 = vpop.f32.mrf.mxu0  ;;  %v6095_v63 = vpop.f32.mrf.mxu1 }
 0x13e   :  { %v125_v0 = vpop.f32.mrf.mxu0 }
 0x13f   :  { %v338_v1 = vpop.f32.mrf.mxu1 }
 0x140   :  { %v339_v11 = vadd.f32 %v338_v1, %v194_v61  ;;  %v1497_v61 = vpop.permute.xlu1 %1496 }
 0x141   :  { %v267_v3 = vpop.f32.mrf.mxu0  ;;  %v6100_v4 = vpop.f32.mrf.mxu1 }
 0x142   :  { %v268_v28 = vadd.f32 %v267_v3, %v123_v62  ;;  %v1473_v4 = vpop.permute.xlu0 %1472 }
 0x143   :  { %v269_v5 = vpop.f32.mrf.mxu0  ;;  %v496_v6 = vpop.f32.mrf.mxu1 }
 0x144   :  { %v502_v17 = vadd.f32 %v496_v6, %v339_v11  ;;  %v270_v37 = vadd.f32 %v269_v5, %v125_v0 }
 0x145   :  { %v425_v8 = vpop.f32.mrf.mxu0  ;;  %v6105_v10 = vpop.f32.mrf.mxu1 }
 0x146   :  { %v500_v38 = vadd.f32 %v425_v8, %v268_v28 }
 0x147   :  { %v427_v12 = vpop.f32.mrf.mxu0  ;;  %v657_v13 = vpop.f32.mrf.mxu1 }
 0x148   :  { %v663_v23 = vadd.f32 %v657_v13, %v502_v17  ;;  %v501_v44 = vadd.f32 %v427_v12, %v270_v37 }
 0x149   :  { %v586_v15 = vpop.f32.mrf.mxu0  ;;  %v6110_v16 = vpop.f32.mrf.mxu1 }
 0x14a   :  { %v661_v45 = vadd.f32 %v586_v15, %v500_v38  ;;  %v1499_v15 = vpop.permute.xlu1 %1498 }
 0x14b   :  { %v588_v18 = vpop.f32.mrf.mxu0 }
 0x14c   :  { %v818_v19 = vpop.f32.mrf.mxu1  ;;  %v662_v49 = vadd.f32 %v588_v18, %v501_v44 }
 0x14d   :  { %v747_v20 = vpop.f32.mrf.mxu0  ;;  %v824_v29 = vadd.f32 %v818_v19, %v663_v23  ;;  %v1501_v19 = vpop.permute.xlu0 %1500 }
 0x14e   :  { %v6115_v22 = vpop.f32.mrf.mxu1  ;;  %v822_v50 = vadd.f32 %v747_v20, %v661_v45  ;;  %v1502_v20 = vsel %vm672_vm5, %v1497_v61, %v1499_v15 }
 0x14f   :  { %v749_v26 = vpop.f32.mrf.mxu0 }
 0x150   :  { %v979_v24 = vpop.f32.mrf.mxu1  ;;  %v823_v54 = vadd.f32 %v749_v26, %v662_v49  ;;  %v1503_v26 = vsel %vm672_vm5, %v1499_v15, %v1501_v19 }
 0x151   :  { %v985_v39 = vadd.f32 %v979_v24, %v824_v29  ;;  %v6597_v29 = vld [vmem:[%s7142_s0 + $0x20] sm:$0xff] }
 0x152   :  { %v6120_v27 = vpop.f32.mrf.mxu1 }
 0x153   :  { %v908_v31 = vpop.f32.mrf.mxu0 }
 0x154   :  { %v983_v55 = vadd.f32 %v908_v31, %v822_v50  ;;  %v6603_v31 = vld [vmem:[%s7142_s0 + $0x28] sm:$0xff] }
 0x155   :  { %v910_v33 = vpop.f32.mrf.mxu0 }
 0x156   :  { %v984_v59 = vadd.f32 %v910_v33, %v823_v54  ;;  %v6610_v33 = vld [vmem:[%s7142_s0 + $0x18] sm:$0xff] }
 0x157   :  { %v1140_v41 = vpop.f32.mrf.mxu1  ;;  %v4413_v45 = vrot.slane %v6610_v33, %v6421_v7 }
 0x158   :  { %v1069_v42 = vpop.f32.mrf.mxu0  ;;  %v1146_v46 = vadd.f32 %v1140_v41, %v985_v39 }
 0x159   :  { %v6125_v43 = vpop.f32.mrf.mxu1  ;;  %v1144_v60 = vadd.f32 %v1069_v42, %v983_v55 }
 0x15a   :  { %v1071_v52 = vpop.f32.mrf.mxu0 }
 0x15b   :  { %v1301_v47 = vpop.f32.mrf.mxu1  ;;  %v1145_v0 = vadd.f32 %v1071_v52, %v984_v59 }
 0x15c   :  { %v1307_v57 = vadd.f32 %v1301_v47, %v1146_v46  ;;  %v4417_v46 = vrot.slane %v6597_v29, %v6421_v7  ;;  %v4421_v47 = vrot.slane %v6603_v31, %v6421_v7 }
 0x15d   :  { %v6130_v53 = vpop.f32.mrf.mxu1 }
 0x15f   :  { %v1230_v58 = vpop.f32.mrf.mxu0 }
 0x160   :  { %v1305_v1 = vadd.f32 %v1230_v58, %v1144_v60  ;;  %v6743_v60 = vld [vmem:[%s7145_s3 + $0x8] sm:$0xff] }
 0x161   :  { %v1232_v62 = vpop.f32.mrf.mxu0 }
 0x162   :  { %v1462_v63 = vpop.f32.mrf.mxu1  ;;  %v1306_v8 = vadd.f32 %v1232_v62, %v1145_v0 }
 0x163   :  { %v1468_v3 = vadd.f32 %v1462_v63, %v1307_v57 }
 0x164   :  { %v1391_v5 = vpop.f32.mrf.mxu0  ;;  %v6135_v6 = vpop.f32.mrf.mxu1 }
 0x165   :  { %v1466_v10 = vadd.f32 %v1391_v5, %v1305_v1  ;;  %v1477_v12 = vadd.f32 %v1473_v4, %v1468_v3  ;;  %v6753_v1 = vld [vmem:[%s7145_s3] sm:$0xff]  ;;  %v6773_v5 = vld [vmem:[%s7145_s3 + $0x10] sm:$0xff] }
 0x166   :  { %v1393_v11 = vpop.f32.mrf.mxu0 }
 0x167   :  { %v1475_v13 = vadd.f32 %v1473_v4, %v1466_v10  ;;  %v1467_v16 = vadd.f32 %v1393_v11, %v1306_v8  ;;  %v1480_v24 = vmax.f32 %v1477_v12, 0.0  ;;  %v6788_v12 = vld [vmem:[%s7145_s3 + $0x18] sm:$0xff] }
 0x169   :  { %v1478_v17 = vmax.f32 %v1475_v13, 0.0  ;;  %v1476_v18 = vadd.f32 %v1473_v4, %v1467_v16  ;;  %v1509_v28 = vmul.f32 %v1501_v19, %v1480_v24  ;;  %v6818_v24 = vld [vmem:[%s7145_s3 + $0x28] sm:$0xff] }
 0x16b   :  { %v1507_v22 = vmul.f32 %v1502_v20, %v1478_v17  ;;  %v1479_v23 = vmax.f32 %v1476_v18, 0.0  ;;  %v6803_v18 = vld [vmem:[%s7145_s3 + $0x20] sm:$0xff] }
 0x16d   :  { %v1508_v27 = vmul.f32 %v1503_v26, %v1479_v23  ;;  %1513 = vrot.lane.b32.xlu1 %v1507_v22, %s6322_s1 }
 0x16f   :  { %1515 = vrot.lane.b32.xlu0 %v1508_v27, %s6322_s1 }
 0x171   :  { %1517 = vrot.lane.b32.xlu1 %v1509_v28, %s6322_s1 }
 0x173   :  { %2988 = vrot.lane.b32.xlu0 %v6597_v29, %s6311_s22 }
 0x175   :  { %2990 = vrot.lane.b32.xlu1 %v6603_v31, %s6311_s22 }
 0x177   :  { %2986 = vrot.lane.b32.xlu0 %v6610_v33, %s6311_s22 }
 0x1df   :  { %v1514_v37 = vpop.permute.xlu1 %1513 }
 0x1e0   :  { %1526 = vst.msk [vmem:[#allocation2] sm:$0xff] %vm1525_vm11, %v1514_v37 }
 0x1e1   :  { %v1516_v38 = vpop.permute.xlu0 %1515 }
 0x1e2   :  { %v6618_v39 = vsel %vm1519_vm12, %v1514_v37, %v1516_v38 }
 0x1e3   :  { %v1518_v41 = vpop.permute.xlu1 %1517 }
 0x1e4   :  { %v1521_v42 = vsel %vm1519_vm12, %v1516_v38, %v1518_v41  ;;  %v6834_v38 = vld [vmem:[%s7145_s3 + $0x30] sm:$0xff] }
 0x1e5   :  { %1529 = vst.msk [vmem:[#allocation2 + $0x10] sm:$0xff] %vm1528_vm13, %v1521_v42  ;;  %v6726_v49 = vpop.permute.xlu0 %2988 }
 0x1e7   :  { %v6622_v43 = vld [vmem:[#allocation2] sm:$0xff] }
 0x1e8   :  { %1840 = vrot.lane.b32.xlu1 %v6622_v43, %s6314_s25  ;;  %1539 = vrot.lane.b32.xlu0 %v6622_v43, %s6311_s22 }
 0x1e9   :  { %v6728_v50 = vpop.permute.xlu0 %2986 }
 0x1ec   :  { %2160 = vrot.lane.b32.xlu1 %v6622_v43, %s6316_s27  ;;  %2000 = vrot.lane.b32.xlu0 %v6622_v43, %s6315_s26  ;;  %v6640_v44 = vld [vmem:[#allocation2 + $0x10] sm:$0xff] }
 0x1f0   :  { %2480 = vrot.lane.b32.xlu1 %v6622_v43, %s6318_s29  ;;  %2320 = vrot.lane.b32.xlu0 %v6622_v43, %s6317_s28 }
 0x1f4   :  { %2800 = vrot.lane.b32.xlu1 %v6622_v43, %s6321_s6  ;;  %2640 = vrot.lane.b32.xlu0 %v6622_v43, %s6320_s30 }
 0x1f8   :  { %1543 = vrot.lane.b32.xlu1 %v6640_v44, %s6311_s22  ;;  %1541 = vrot.lane.b32.xlu0 %v6618_v39, %s6311_s22 }
 0x1fc   :  { %3288 = vrot.lane.b32.xlu1 %v6597_v29, %s6314_s25  ;;  %3290 = vrot.lane.b32.xlu0 %v6603_v31, %s6314_s25 }
 0x200   :  { %1842 = vrot.lane.b32.xlu1 %v6618_v39, %s6314_s25  ;;  %1844 = vrot.lane.b32.xlu0 %v6640_v44, %s6314_s25 }
 0x204   :  { %2004 = vrot.lane.b32.xlu1 %v6640_v44, %s6315_s26  ;;  %2002 = vrot.lane.b32.xlu0 %v6618_v39, %s6315_s26 }
 0x208   :  { %2162 = vrot.lane.b32.xlu1 %v6618_v39, %s6316_s27  ;;  %2164 = vrot.lane.b32.xlu0 %v6640_v44, %s6316_s27 }
 0x20c   :  { %2324 = vrot.lane.b32.xlu1 %v6640_v44, %s6317_s28  ;;  %2322 = vrot.lane.b32.xlu0 %v6618_v39, %s6317_s28 }
 0x210   :  { %2482 = vrot.lane.b32.xlu1 %v6618_v39, %s6318_s29  ;;  %2484 = vrot.lane.b32.xlu0 %v6640_v44, %s6318_s29 }
 0x214   :  { %2644 = vrot.lane.b32.xlu1 %v6640_v44, %s6320_s30  ;;  %2642 = vrot.lane.b32.xlu0 %v6618_v39, %s6320_s30 }
 0x218   :  { %2802 = vrot.lane.b32.xlu1 %v6618_v39, %s6321_s6  ;;  %2804 = vrot.lane.b32.xlu0 %v6640_v44, %s6321_s6 }
 0x21c   :  { %3286 = vrot.lane.b32.xlu1 %v6610_v33, %s6314_s25  ;;  %3447 = vrot.lane.b32.xlu0 %v6597_v29, %s6315_s26 }
 0x220   :  { %3449 = vrot.lane.b32.xlu1 %v6603_v31, %s6315_s26  ;;  %3445 = vrot.lane.b32.xlu0 %v6610_v33, %s6315_s26 }
 0x224   :  { %3606 = vrot.lane.b32.xlu1 %v6597_v29, %s6316_s27  ;;  %3608 = vrot.lane.b32.xlu0 %v6603_v31, %s6316_s27 }
 0x228   :  { %3604 = vrot.lane.b32.xlu1 %v6610_v33, %s6316_s27  ;;  %3765 = vrot.lane.b32.xlu0 %v6597_v29, %s6317_s28 }
 0x22c   :  { %3767 = vrot.lane.b32.xlu1 %v6603_v31, %s6317_s28  ;;  %3763 = vrot.lane.b32.xlu0 %v6610_v33, %s6317_s28 }
 0x230   :  { %3924 = vrot.lane.b32.xlu1 %v6597_v29, %s6318_s29  ;;  %3926 = vrot.lane.b32.xlu0 %v6603_v31, %s6318_s29 }
 0x234   :  { %3922 = vrot.lane.b32.xlu1 %v6610_v33, %s6318_s29  ;;  %4083 = vrot.lane.b32.xlu0 %v6597_v29, %s6320_s30 }
 0x238   :  { %4085 = vrot.lane.b32.xlu1 %v6603_v31, %s6320_s30  ;;  %4081 = vrot.lane.b32.xlu0 %v6610_v33, %s6320_s30 }
 0x23c   :  { %4242 = vrot.lane.b32.xlu1 %v6597_v29, %s6321_s6  ;;  %4244 = vrot.lane.b32.xlu0 %v6603_v31, %s6321_s6 }
 0x240   :  { %4240 = vrot.lane.b32.xlu1 %v6610_v33, %s6321_s6  ;;  %4401 = vperm.xlu0 %6286, %v6432_v9   ;;  %v6730_v9 = vpop.permute.xlu1 %2990 }
 0x244   :  { %4425 = vrot.lane.b32.xlu1 %v4413_v45, %s6316_s27  ;;  %4427 = vrot.lane.b32.xlu0 %v4417_v46, %s6316_s27 }
 0x248   :  { %4429 = vrot.lane.b32.xlu1 %v4421_v47, %s6316_s27 }
 0x25a   :  { %v1841_v52 = vpop.permute.xlu1 %1840  ;;  %v1540_v53 = vpop.permute.xlu0 %1539 }
 0x25e   :  { %v2161_v54 = vpop.permute.xlu1 %2160  ;;  %v2001_v55 = vpop.permute.xlu0 %2000 }
 0x262   :  { %v6732_v57 = vpop.permute.xlu1 %2480  ;;  %v6734_v58 = vpop.permute.xlu0 %2320 }
 0x266   :  { %v6736_v59 = vpop.permute.xlu1 %2800  ;;  %v6738_v7 = vpop.permute.xlu0 %2640 }
 0x26a   :  { %v1544_v61 = vpop.permute.xlu1 %1543  ;;  %v1542_v62 = vpop.permute.xlu0 %1541 }
 0x26b   :  { %v1545_v63 = vsel %vm47_vm1, %v1540_v53, %v1542_v62  ;;  %6137 = vmatpush3.msra.mxu1 %v1544_v61  ;;  %v1546_v0 = vsel %vm47_vm1, %v1542_v62, %v1544_v61  ;;  %v6866_v53 = vld [vmem:[%s7145_s3 + $0x40] sm:$0xff]  ;;  %v2992_v62 = vsel %vm47_vm1, %v6728_v50, %v6726_v49 }
 0x26c   :  { %1583 = vmatprep.subr.mxu0 %v1546_v0  ;;  %6139 = vmatmul.mubr.msk.f32.vlgmr.msra.gmra.mxu1 %vm53_vm2, %v6743_v60 }
 0x26d   :  { %6141 = vmatprep.subr.mxu1 %v6312_v2  ;;  %1584 = vmatpush1.msra.mxu0 %v1545_v63 }
 0x26e   :  { %6142 = vmatpush3.msra.mxu1 %v6640_v44  ;;  %v6756_v3 = vpop.permute.xlu1 %3288  ;;  %5939 = vmatmul.mubr.msk.f32.vlgmr.msra.gmra.mxu0 %vm53_vm2, %v6743_v60  ;;  %v6760_v4 = vpop.permute.xlu0 %3290  ;;  %v6850_v44 = vld [vmem:[%s7145_s3 + $0x38] sm:$0xff] }
 0x26f   :  { %1727 = vmatprep.subr.mxu0 %v6618_v39  ;;  %6143 = vmatprep.mubr.msk.f32.mxu1 %vm6313_vm0, %v6312_v2 }
 0x270   :  { %1728 = vmatpush1.msra.mxu0 %v6622_v43  ;;  %6144 = vmatmul.mubr.msk.f32.vlgmr.msra.gmra.mxu1 %vm53_vm2, %v6753_v1 }
 0x271   :  { %1761 = vmatprep.mubr.f32.mxu0 %v6312_v2  ;;  %6146 = vmatprep.subr.mxu1 %v6312_v2 }
 0x272   :  { %v1843_v6 = vpop.permute.xlu1 %1842  ;;  %5941 = vmatmul.mubr.msk.f32.vlgmr.msra.gmra.mxu0 %vm53_vm2, %v6753_v1  ;;  %v1845_v8 = vpop.permute.xlu0 %1844  ;;  %6148 = vmatprep.mubr.msk.f32.mxu1 %vm6313_vm0, %v6312_v2 }
 0x273   :  { %v1846_v10 = vsel %vm350_vm3, %v1841_v52, %v1843_v6  ;;  %6147 = vmatpush3.msra.mxu1 %v1845_v8  ;;  %v1847_v11 = vsel %vm350_vm3, %v1843_v6, %v1845_v8  ;;  %1918 = vmatprep.mubr.f32.mxu0 %v6312_v2 }
 0x274   :  { %1884 = vmatprep.subr.mxu0 %v1847_v11  ;;  %6149 = vmatmul.mubr.msk.f32.vlgmr.msra.gmra.mxu1 %vm53_vm2, %v6773_v5 }
 0x275   :  { %1885 = vmatpush1.msra.mxu0 %v1846_v10  ;;  %6151 = vmatprep.subr.mxu1 %v6312_v2  ;;  %v6946_v10 = vld [vmem:[#allocation2 + $0x18] sm:$0xff] }
 0x276   :  { %v2005_v13 = vpop.permute.xlu1 %2004  ;;  %5944 = vmatmul.mubr.msk.f32.vlgmr.msra.gmra.mxu0 %vm53_vm2, %v6773_v5  ;;  %v2003_v15 = vpop.permute.xlu0 %2002  ;;  %6153 = vmatprep.mubr.msk.f32.mxu1 %vm6313_vm0, %v6312_v2 }
 0x277   :  { %v2006_v16 = vsel %vm511_vm4, %v2001_v55, %v2003_v15  ;;  %6152 = vmatpush3.msra.mxu1 %v2005_v13  ;;  %v2007_v17 = vsel %vm511_vm4, %v2003_v15, %v2005_v13  ;;  %2078 = vmatprep.mubr.f32.mxu0 %v6312_v2 }
 0x278   :  { %2044 = vmatprep.subr.mxu0 %v2007_v17  ;;  %6154 = vmatmul.mubr.msk.f32.vlgmr.msra.gmra.mxu1 %vm53_vm2, %v6788_v12 }
 0x279   :  { %2045 = vmatpush1.msra.mxu0 %v2006_v16  ;;  %6156 = vmatprep.subr.mxu1 %v6312_v2 }
 0x27a   :  { %v2163_v19 = vpop.permute.xlu1 %2162  ;;  %5947 = vmatmul.mubr.msk.f32.vlgmr.msra.gmra.mxu0 %vm53_vm2, %v6788_v12  ;;  %v2165_v20 = vpop.permute.xlu0 %2164  ;;  %6158 = vmatprep.mubr.msk.f32.mxu1 %vm6313_vm0, %v6312_v2 }
 0x27b   :  { %v2166_v22 = vsel %vm672_vm5, %v2161_v54, %v2163_v19  ;;  %6157 = vmatpush3.msra.mxu1 %v2165_v20  ;;  %v2167_v23 = vsel %vm672_vm5, %v2163_v19, %v2165_v20  ;;  %2238 = vmatprep.mubr.f32.mxu0 %v6312_v2 }
 0x27c   :  { %2204 = vmatprep.subr.mxu0 %v2167_v23  ;;  %6159 = vmatmul.mubr.msk.f32.vlgmr.msra.gmra.mxu1 %vm53_vm2, %v6803_v18 }
 0x27d   :  { %2205 = vmatpush1.msra.mxu0 %v2166_v22  ;;  %6161 = vmatprep.subr.mxu1 %v6312_v2 }
 0x27e   :  { %v2325_v26 = vpop.permute.xlu1 %2324  ;;  %5950 = vmatmul.mubr.msk.f32.vlgmr.msra.gmra.mxu0 %vm53_vm2, %v6803_v18  ;;  %v2323_v27 = vpop.permute.xlu0 %2322  ;;  %6163 = vmatprep.mubr.msk.f32.mxu1 %vm6313_vm0, %v6312_v2 }
 0x27f   :  { %v2326_v28 = vsel %vm833_vm6, %v6734_v58, %v2323_v27  ;;  %6162 = vmatpush3.msra.mxu1 %v2325_v26  ;;  %v2327_v37 = vsel %vm833_vm6, %v2323_v27, %v2325_v26  ;;  %2398 = vmatprep.mubr.f32.mxu0 %v6312_v2 }
 0x280   :  { %2364 = vmatprep.subr.mxu0 %v2327_v37  ;;  %6164 = vmatmul.mubr.msk.f32.vlgmr.msra.gmra.mxu1 %vm53_vm2, %v6818_v24 }
 0x281   :  { %2365 = vmatpush1.msra.mxu0 %v2326_v28  ;;  %6166 = vmatprep.subr.mxu1 %v6312_v2 }
 0x282   :  { %v2483_v39 = vpop.permute.xlu1 %2482  ;;  %5953 = vmatmul.mubr.msk.f32.vlgmr.msra.gmra.mxu0 %vm53_vm2, %v6818_v24  ;;  %v2485_v41 = vpop.permute.xlu0 %2484  ;;  %6168 = vmatprep.mubr.msk.f32.mxu1 %vm6313_vm0, %v6312_v2 }
 0x283   :  { %v2486_v42 = vsel %vm994_vm7, %v6732_v57, %v2483_v39  ;;  %6167 = vmatpush3.msra.mxu1 %v2485_v41  ;;  %v2487_v43 = vsel %vm994_vm7, %v2483_v39, %v2485_v41  ;;  %2558 = vmatprep.mubr.f32.mxu0 %v6312_v2 }
 0x284   :  { %2524 = vmatprep.subr.mxu0 %v2487_v43  ;;  %6169 = vmatmul.mubr.msk.f32.vlgmr.msra.gmra.mxu1 %vm53_vm2, %v6834_v38 }
 0x285   :  { %2525 = vmatpush1.msra.mxu0 %v2486_v42  ;;  %6171 = vmatprep.subr.mxu1 %v6312_v2 }
 0x286   :  { %v2645_v45 = vpop.permute.xlu1 %2644  ;;  %5956 = vmatmul.mubr.msk.f32.vlgmr.msra.gmra.mxu0 %vm53_vm2, %v6834_v38  ;;  %v2643_v46 = vpop.permute.xlu0 %2642  ;;  %6173 = vmatprep.mubr.msk.f32.mxu1 %vm6313_vm0, %v6312_v2 }
 0x287   :  { %v2646_v47 = vsel %vm1155_vm8, %v6738_v7, %v2643_v46  ;;  %6172 = vmatpush3.msra.mxu1 %v2645_v45  ;;  %v2647_v52 = vsel %vm1155_vm8, %v2643_v46, %v2645_v45  ;;  %2718 = vmatprep.mubr.f32.mxu0 %v6312_v2 }
 0x288   :  { %2684 = vmatprep.subr.mxu0 %v2647_v52  ;;  %6174 = vmatmul.mubr.msk.f32.vlgmr.msra.gmra.mxu1 %vm53_vm2, %v6850_v44 }
 0x289   :  { %2685 = vmatpush1.msra.mxu0 %v2646_v47  ;;  %6176 = vmatprep.subr.mxu1 %v6312_v2 }
 0x28a   :  { %v2803_v54 = vpop.permute.xlu1 %2802  ;;  %5959 = vmatmul.mubr.msk.f32.vlgmr.msra.gmra.mxu0 %vm53_vm2, %v6850_v44  ;;  %v2805_v55 = vpop.permute.xlu0 %2804  ;;  %6178 = vmatprep.mubr.msk.f32.mxu1 %vm6313_vm0, %v6312_v2 }
 0x28b   :  { %v2806_v57 = vsel %vm1316_vm9, %v6736_v59, %v2803_v54  ;;  %6177 = vmatpush3.msra.mxu1 %v2805_v55  ;;  %v2807_v58 = vsel %vm1316_vm9, %v2803_v54, %v2805_v55  ;;  %2878 = vmatprep.mubr.f32.mxu0 %v6312_v2  ;;  %v2993_v59 = vsel %vm47_vm1, %v6726_v49, %v6730_v9 }
 0x28c   :  { %2844 = vmatprep.subr.mxu0 %v2807_v58  ;;  %6179 = vmatmul.mubr.msk.f32.vlgmr.msra.gmra.mxu1 %vm53_vm2, %v6866_v53  ;;  %v3293_v49 = vsel %vm350_vm3, %v6756_v3, %v6760_v4 }
 0x28d   :  { %6181 = vmatprep.subr.mxu1 %v6312_v2  ;;  %2845 = vmatpush1.msra.mxu0 %v2806_v57 }
 0x28e   :  { %6182 = vmatpush3.msra.mxu1 %v6730_v9  ;;  %v3287_v7 = vpop.permute.xlu1 %3286  ;;  %5962 = vmatmul.mubr.msk.f32.vlgmr.msra.gmra.mxu0 %vm53_vm2, %v6866_v53  ;;  %v3448_v61 = vpop.permute.xlu0 %3447 }
 0x28f   :  { %3030 = vmatprep.subr.mxu0 %v2993_v59  ;;  %6183 = vmatprep.mubr.msk.f32.mxu1 %vm6313_vm0, %v6312_v2 }
 0x290   :  { %3031 = vmatpush1.msra.mxu0 %v2992_v62  ;;  %6184 = vmatmul.mubr.msk.f32.vlgmr.msra.gmra.mxu1 %vm53_vm2, %v6445_v14 }
 0x291   :  { %3064 = vmatprep.mubr.f32.mxu0 %v6312_v2  ;;  %3174 = vmatprep.subr.mxu0 %v6597_v29 }
 0x292   :  { %6186 = vmatprep.subr.mxu1 %v6312_v2  ;;  %v3450_v9 = vpop.permute.xlu1 %3449  ;;  %5968 = vmatmul.mubr.msk.f32.vlgmr.msra.gmra.mxu0 %vm53_vm2, %v6445_v14  ;;  %v3446_v63 = vpop.permute.xlu0 %3445 }
 0x293   :  { %3175 = vmatpush1.msra.mxu0 %v6610_v33  ;;  %6187 = vmatpush3.msra.mxu1 %v6603_v31  ;;  %v3292_v31 = vsel %vm350_vm3, %v3287_v7, %v6756_v3  ;;  %v3452_v33 = vsel %vm511_vm4, %v3448_v61, %v3450_v9  ;;  %v3451_v3 = vsel %vm511_vm4, %v3446_v63, %v3448_v61 }
 0x294   :  { %6188 = vmatprep.mubr.msk.f32.mxu1 %vm6313_vm0, %v6312_v2  ;;  %3330 = vmatprep.subr.mxu0 %v3293_v49 }
 0x295   :  { %6191 = vmatprep.subr.mxu1 %v6312_v2  ;;  %6189 = vmatmul.mubr.msk.f32.vlgmr.msra.gmra.mxu1 %vm53_vm2, %v6458_v21 }
 0x296   :  { %6192 = vmatpush3.msra.mxu1 %v6760_v4  ;;  %3208 = vmatprep.mubr.f32.mxu0 %v6312_v2  ;;  %v3607_v14 = vpop.permute.xlu1 %3606  ;;  %v6909_v29 = vpop.permute.xlu0 %3608 }
 0x297   :  { %5970 = vmatmul.mubr.msk.f32.vlgmr.msra.gmra.mxu0 %vm53_vm2, %v6458_v21  ;;  %6193 = vmatprep.mubr.msk.f32.mxu1 %vm6313_vm0, %v6312_v2  ;;  %v6929_v21 = vsel %vm672_vm5, %v3607_v14, %v6909_v29 }
 0x298   :  { %3331 = vmatpush1.msra.mxu0 %v3292_v31  ;;  %6196 = vmatprep.subr.mxu1 %v6312_v2 }
 0x299   :  { %3489 = vmatprep.subr.mxu0 %v3452_v33  ;;  %6194 = vmatmul.mubr.msk.f32.vlgmr.msra.gmra.mxu1 %vm53_vm2, %v6472_v25 }
 0x29a   :  { %6197 = vmatpush3.msra.mxu1 %v3450_v9  ;;  %3364 = vmatprep.mubr.f32.mxu0 %v6312_v2  ;;  %v3605_v50 = vpop.permute.xlu1 %3604  ;;  %v3766_v0 = vpop.permute.xlu0 %3765 }
 0x29b   :  { %5973 = vmatmul.mubr.msk.f32.vlgmr.msra.gmra.mxu0 %vm53_vm2, %v6472_v25  ;;  %6198 = vmatprep.mubr.msk.f32.mxu1 %vm6313_vm0, %v6312_v2  ;;  %v6938_v6 = vsel %vm672_vm5, %v3605_v50, %v3607_v14 }
 0x29c   :  { %3490 = vmatpush1.msra.mxu0 %v3451_v3  ;;  %6201 = vmatprep.subr.mxu1 %v6312_v2 }
 0x29d   :  { %3648 = vmatprep.subr.mxu0 %v6929_v21  ;;  %6199 = vmatmul.mubr.msk.f32.vlgmr.msra.gmra.mxu1 %vm53_vm2, %v6487_v30 }
 0x29e   :  { %6202 = vmatpush3.msra.mxu1 %v6909_v29  ;;  %3523 = vmatprep.mubr.f32.mxu0 %v6312_v2  ;;  %v3768_v25 = vpop.permute.xlu1 %3767  ;;  %v3764_v4 = vpop.permute.xlu0 %3763 }
 0x29f   :  { %5976 = vmatmul.mubr.msk.f32.vlgmr.msra.gmra.mxu0 %vm53_vm2, %v6487_v30  ;;  %6203 = vmatprep.mubr.msk.f32.mxu1 %vm6313_vm0, %v6312_v2  ;;  %v3770_v8 = vsel %vm833_vm6, %v3766_v0, %v3768_v25  ;;  %v3769_v13 = vsel %vm833_vm6, %v3764_v4, %v3766_v0 }
 0x2a0   :  { %3649 = vmatpush1.msra.mxu0 %v6938_v6  ;;  %6206 = vmatprep.subr.mxu1 %v6946_v10 }
 0x2a1   :  { %6204 = vmatmul.mubr.msk.f32.vlgmr.msra.gmra.mxu1 %vm53_vm2, %v6517_v36  ;;  %3807 = vmatprep.subr.mxu0 %v3770_v8 }
 0x2a2   :  { %6207 = vmatpush3.msra.mxu1 %v3768_v25  ;;  %3682 = vmatprep.mubr.f32.mxu0 %v6946_v10  ;;  %v3925_v11 = vpop.permute.xlu1 %3924  ;;  %v3927_v30 = vpop.permute.xlu0 %3926 }
 0x2a3   :  { %5979 = vmatmul.mubr.msk.f32.vlgmr.msra.gmra.mxu0 %vm53_vm2, %v6517_v36  ;;  %6208 = vmatprep.mubr.msk.f32.mxu1 %vm6313_vm0, %v6946_v10  ;;  %v3929_v2 = vsel %vm994_vm7, %v3925_v11, %v3927_v30 }
 0x2a4   :  { %3808 = vmatpush1.msra.mxu0 %v3769_v13  ;;  %3841 = vmatprep.mubr.f32.mxu0 %v6946_v10 }
 0x2a5   :  { %6209 = vmatmul.mubr.msk.f32.vlgmr.msra.gmra.mxu1 %vm53_vm2, %v6530_v40  ;;  %3966 = vmatprep.subr.mxu0 %v3929_v2 }
 0x2a6   :  { %6211 = vmatprep.subr.mxu1 %v6946_v10  ;;  %v3923_v15 = vpop.permute.xlu1 %3922  ;;  %v4084_v16 = vpop.permute.xlu0 %4083  ;;  %6213 = vmatprep.mubr.msk.f32.mxu1 %vm6313_vm0, %v6946_v10 }
 0x2a7   :  { %v3928_v36 = vsel %vm994_vm7, %v3923_v15, %v3925_v11  ;;  %5982 = vmatmul.mubr.msk.f32.vlgmr.msra.gmra.mxu0 %vm53_vm2, %v6530_v40  ;;  %6212 = vmatpush3.msra.mxu1 %v3927_v30 }
 0x2a8   :  { %3967 = vmatpush1.msra.mxu0 %v3928_v36  ;;  %4000 = vmatprep.mubr.f32.mxu0 %v6946_v10 }
 0x2a9   :  { %6214 = vmatmul.mubr.msk.f32.vlgmr.msra.gmra.mxu1 %vm53_vm2, %v6548_v48  ;;  %6216 = vmatprep.subr.mxu1 %v6946_v10 }
 0x2aa   :  { %v4086_v17 = vpop.permute.xlu1 %4085  ;;  %v4082_v19 = vpop.permute.xlu0 %4081  ;;  %6218 = vmatprep.mubr.msk.f32.mxu1 %vm6313_vm0, %v6946_v10 }
 0x2ab   :  { %5985 = vmatmul.mubr.msk.f32.vlgmr.msra.gmra.mxu0 %vm53_vm2, %v6548_v48  ;;  %v4087_v20 = vsel %vm1155_vm8, %v4082_v19, %v4084_v16  ;;  %6217 = vmatpush3.msra.mxu1 %v4086_v17  ;;  %v4088_v40 = vsel %vm1155_vm8, %v4084_v16, %v4086_v17 }
 0x2ac   :  { %4125 = vmatprep.subr.mxu0 %v4088_v40  ;;  %4159 = vmatprep.mubr.f32.mxu0 %v6946_v10 }
 0x2ad   :  { %6219 = vmatmul.mubr.msk.f32.vlgmr.msra.gmra.mxu1 %vm53_vm2, %v6560_v51  ;;  %4126 = vmatpush1.msra.mxu0 %v4087_v20 }
 0x2ae   :  { %v4243_v22 = vpop.permute.xlu1 %4242  ;;  %6221 = vmatprep.subr.mxu1 %v6946_v10  ;;  %v4245_v23 = vpop.permute.xlu0 %4244  ;;  %6223 = vmatprep.mubr.msk.f32.mxu1 %vm6313_vm0, %v6946_v10 }
 0x2af   :  { %5988 = vmatmul.mubr.msk.f32.vlgmr.msra.gmra.mxu0 %vm53_vm2, %v6560_v51  ;;  %6222 = vmatpush3.msra.mxu1 %v4245_v23  ;;  %v4247_v48 = vsel %vm1316_vm9, %v4243_v22, %v4245_v23 }
 0x2b0   :  { %4284 = vmatprep.subr.mxu0 %v4247_v48  ;;  %4318 = vmatprep.mubr.f32.mxu0 %v6946_v10 }
 0x2b1   :  { %6224 = vmatmul.mubr.msk.f32.vlgmr.msra.gmra.mxu1 %vm53_vm2, %v6575_v56  ;;  %6226 = vmatprep.subr.mxu1 %v6946_v10 }
 0x2b2   :  { %v4241_v26 = vpop.permute.xlu1 %4240  ;;  %6228 = vmatprep.mubr.msk.f32.mxu1 %vm6313_vm0, %v6946_v10 }
 0x2b3   :  { %v4246_v27 = vsel %vm1316_vm9, %v4241_v26, %v4243_v22 }
 0x2b4   :  { %4285 = vmatpush1.msra.mxu0 %v4246_v27 }
 0x2b5   :  { %5991 = vmatmul.mubr.msk.f32.vlgmr.msra.gmra.mxu0 %vm53_vm2, %v6575_v56 }
 0x2b6   :  { %4543 = vmatprep.mubr.f32.mxu0 %v6946_v10 }
 0x32c   :  { %v1690_v51 = vpop.f32.mrf.mxu1 }
 0x32e   :  { %v1619_v28 = vpop.f32.mrf.mxu0  ;;  %v6140_v37 = vpop.f32.mrf.mxu1 }
 0x330   :  { %v1621_v39 = vpop.f32.mrf.mxu0  ;;  %v1834_v41 = vpop.f32.mrf.mxu1 }
 0x331   :  { %v1835_v42 = vadd.f32 %v1834_v41, %v1690_v51 }
 0x332   :  { %v1763_v43 = vpop.f32.mrf.mxu0  ;;  %v6145_v45 = vpop.f32.mrf.mxu1 }
 0x333   :  { %v1764_v46 = vadd.f32 %v1763_v43, %v1619_v28 }
 0x334   :  { %v1765_v47 = vpop.f32.mrf.mxu0  ;;  %v1991_v52 = vpop.f32.mrf.mxu1 }
 0x335   :  { %v1766_v54 = vadd.f32 %v1765_v47, %v1621_v39  ;;  %v1997_v55 = vadd.f32 %v1991_v52, %v1835_v42 }
 0x336   :  { %v1920_v57 = vpop.f32.mrf.mxu0  ;;  %v6150_v58 = vpop.f32.mrf.mxu1 }
 0x337   :  { %v1995_v7 = vadd.f32 %v1920_v57, %v1764_v46 }
 0x338   :  { %v1922_v59 = vpop.f32.mrf.mxu0  ;;  %v2151_v56 = vpop.f32.mrf.mxu1 }
 0x339   :  { %v1996_v61 = vadd.f32 %v1922_v59, %v1766_v54  ;;  %v2157_v62 = vadd.f32 %v2151_v56, %v1997_v55 }
 0x33a   :  { %v2080_v9 = vpop.f32.mrf.mxu0  ;;  %v6155_v63 = vpop.f32.mrf.mxu1 }
 0x33b   :  { %v2155_v49 = vadd.f32 %v2080_v9, %v1995_v7 }
 0x33c   :  { %v2082_v14 = vpop.f32.mrf.mxu0  ;;  %v2311_v31 = vpop.f32.mrf.mxu1 }
 0x33d   :  { %v2156_v33 = vadd.f32 %v2082_v14, %v1996_v61  ;;  %v2317_v50 = vadd.f32 %v2311_v31, %v2157_v62 }
 0x33e   :  { %v2240_v0 = vpop.f32.mrf.mxu0  ;;  %v6160_v3 = vpop.f32.mrf.mxu1 }
 0x33f   :  { %v2315_v25 = vadd.f32 %v2240_v0, %v2155_v49 }
 0x340   :  { %v2242_v4 = vpop.f32.mrf.mxu0  ;;  %v2471_v8 = vpop.f32.mrf.mxu1 }
 0x341   :  { %v2316_v11 = vadd.f32 %v2242_v4, %v2156_v33  ;;  %v2477_v30 = vadd.f32 %v2471_v8, %v2317_v50 }
 0x342   :  { %v2400_v13 = vpop.f32.mrf.mxu0  ;;  %v6165_v2 = vpop.f32.mrf.mxu1 }
 0x343   :  { %v2475_v15 = vadd.f32 %v2400_v13, %v2315_v25 }
 0x344   :  { %v2402_v16 = vpop.f32.mrf.mxu0  ;;  %v2631_v36 = vpop.f32.mrf.mxu1 }
 0x345   :  { %v2476_v17 = vadd.f32 %v2402_v16, %v2316_v11  ;;  %v2637_v19 = vadd.f32 %v2631_v36, %v2477_v30 }
 0x346   :  { %v2560_v20 = vpop.f32.mrf.mxu0  ;;  %v6170_v40 = vpop.f32.mrf.mxu1 }
 0x347   :  { %v2635_v22 = vadd.f32 %v2560_v20, %v2475_v15 }
 0x348   :  { %v2562_v23 = vpop.f32.mrf.mxu0  ;;  %v2791_v48 = vpop.f32.mrf.mxu1 }
 0x349   :  { %v2636_v26 = vadd.f32 %v2562_v23, %v2476_v17  ;;  %v2797_v27 = vadd.f32 %v2791_v48, %v2637_v19 }
 0x34a   :  { %v2720_v51 = vpop.f32.mrf.mxu0  ;;  %v6175_v28 = vpop.f32.mrf.mxu1 }
 0x34b   :  { %v2795_v37 = vadd.f32 %v2720_v51, %v2635_v22 }
 0x34c   :  { %v2722_v39 = vpop.f32.mrf.mxu0  ;;  %v2951_v41 = vpop.f32.mrf.mxu1 }
 0x34d   :  { %v2796_v42 = vadd.f32 %v2722_v39, %v2636_v26  ;;  %v6996_v43 = vadd.f32 %v2951_v41, %v2797_v27 }
 0x34e   :  { %v2880_v45 = vpop.f32.mrf.mxu0  ;;  %v6180_v46 = vpop.f32.mrf.mxu1 }
 0x34f   :  { %v6998_v47 = vadd.f32 %v2880_v45, %v2795_v37 }
 0x350   :  { %v2882_v52 = vpop.f32.mrf.mxu0  ;;  %v3137_v54 = vpop.f32.mrf.mxu1 }
 0x351   :  { %v7000_v55 = vadd.f32 %v2882_v52, %v2796_v42 }
 0x352   :  { %v3066_v57 = vpop.f32.mrf.mxu0  ;;  %v6185_v58 = vpop.f32.mrf.mxu1 }
 0x353   :  { %v4402_v58 = vpop.permute.xlu0 %4401 }
 0x354   :  { %v3068_v7 = vpop.f32.mrf.mxu0 }
 0x355   :  { %v3281_v59 = vpop.f32.mrf.mxu1 }
 0x356   :  { %v3282_v14 = vadd.f32 %v3281_v59, %v3137_v54 }
 0x357   :  { %v3210_v56 = vpop.f32.mrf.mxu0  ;;  %v6190_v61 = vpop.f32.mrf.mxu1 }
 0x358   :  { %v3211_v36 = vadd.f32 %v3210_v56, %v3066_v57 }
 0x359   :  { %v3212_v62 = vpop.f32.mrf.mxu0  ;;  %v3437_v9 = vpop.f32.mrf.mxu1 }
 0x35a   :  { %v3443_v3 = vadd.f32 %v3437_v9, %v3282_v14  ;;  %v3213_v40 = vadd.f32 %v3212_v62, %v3068_v7 }
 0x35b   :  { %v3366_v63 = vpop.f32.mrf.mxu0  ;;  %v6195_v49 = vpop.f32.mrf.mxu1 }
 0x35c   :  { %v3441_v22 = vadd.f32 %v3366_v63, %v3211_v36 }
 0x35d   :  { %v3368_v31 = vpop.f32.mrf.mxu0  ;;  %v3596_v33 = vpop.f32.mrf.mxu1 }
 0x35e   :  { %v3602_v30 = vadd.f32 %v3596_v33, %v3443_v3  ;;  %v3442_v26 = vadd.f32 %v3368_v31, %v3213_v40  ;;  %v4426_v33 = vpop.permute.xlu1 %4425 }
 0x35f   :  { %v3525_v50 = vpop.f32.mrf.mxu0  ;;  %v6200_v0 = vpop.f32.mrf.mxu1 }
 0x360   :  { %v3600_v27 = vadd.f32 %v3525_v50, %v3441_v22  ;;  %v4428_v0 = vpop.permute.xlu0 %4427 }
 0x361   :  { %v3527_v25 = vpop.f32.mrf.mxu0  ;;  %v3755_v4 = vpop.f32.mrf.mxu1 }
 0x362   :  { %v3761_v17 = vadd.f32 %v3755_v4, %v3602_v30  ;;  %v3601_v39 = vadd.f32 %v3527_v25, %v3442_v26 }
 0x363   :  { %v3684_v8 = vpop.f32.mrf.mxu0  ;;  %v6205_v11 = vpop.f32.mrf.mxu1 }
 0x364   :  { %v3759_v41 = vadd.f32 %v3684_v8, %v3600_v27  ;;  %v4431_v11 = vsel %vm672_vm5, %v4426_v33, %v4428_v0 }
 0x365   :  { %v3686_v13 = vpop.f32.mrf.mxu0  ;;  %v3914_v2 = vpop.f32.mrf.mxu1 }
 0x366   :  { %v3920_v51 = vadd.f32 %v3914_v2, %v3761_v17  ;;  %v3760_v46 = vadd.f32 %v3686_v13, %v3601_v39 }
 0x367   :  { %v3843_v15 = vpop.f32.mrf.mxu0  ;;  %v6210_v16 = vpop.f32.mrf.mxu1 }
 0x368   :  { %v3918_v52 = vadd.f32 %v3843_v15, %v3759_v41  ;;  %v4430_v15 = vpop.permute.xlu1 %4429 }
 0x369   :  { %v3845_v19 = vpop.f32.mrf.mxu0  ;;  %v4073_v20 = vpop.f32.mrf.mxu1  ;;  %v4432_v17 = vsel %vm672_vm5, %v4428_v0, %v4430_v15 }
 0x36a   :  { %v4079_v54 = vadd.f32 %v4073_v20, %v3920_v51  ;;  %v3919_v59 = vadd.f32 %v3845_v19, %v3760_v46 }
 0x36b   :  { %v4002_v23 = vpop.f32.mrf.mxu0  ;;  %v6215_v48 = vpop.f32.mrf.mxu1 }
 0x36c   :  { %v4077_v56 = vadd.f32 %v4002_v23, %v3918_v52 }
 0x36d   :  { %v4004_v28 = vpop.f32.mrf.mxu0  ;;  %v4232_v37 = vpop.f32.mrf.mxu1 }
 0x36e   :  { %v4238_v7 = vadd.f32 %v4232_v37, %v4079_v54  ;;  %v4078_v9 = vadd.f32 %v4004_v28, %v3919_v59  ;;  %v2958_v28 = vld [vmem:[%s7146_s4] sm:$0xff]  ;;  %s6323_s4 = smov [#allocation3]  }
 0x36f   :  { %v4161_v42 = vpop.f32.mrf.mxu0  ;;  %v6220_v45 = vpop.f32.mrf.mxu1 }
 0x370   :  { %v4236_v63 = vadd.f32 %v4161_v42, %v4077_v56 }
 0x371   :  { %v4391_v57 = vpop.f32.mrf.mxu1  ;;  %v4163_v61 = vpop.f32.mrf.mxu0 }
 0x372   :  { %v4397_v49 = vadd.f32 %v4391_v57, %v4238_v7  ;;  %v4237_v31 = vadd.f32 %v4163_v61, %v4078_v9 }
 0x373   :  { %v6225_v62 = vpop.f32.mrf.mxu1 }
 0x374   :  { %v4406_v25 = vadd.f32 %v4402_v58, %v4397_v49 }
 0x375   :  { %v4320_v14 = vpop.f32.mrf.mxu0 }
 0x376   :  { %v4395_v50 = vadd.f32 %v4320_v14, %v4236_v63  ;;  %v4409_v2 = vmax.f32 %v4406_v25, 0.0 }
 0x377   :  { %v4322_v3 = vpop.f32.mrf.mxu0 }
 0x378   :  { %v4404_v4 = vadd.f32 %v4402_v58, %v4395_v50  ;;  %v4396_v8 = vadd.f32 %v4322_v3, %v4237_v31  ;;  %v4438_v20 = vmul.f32 %v4430_v15, %v4409_v2 }
 0x37a   :  { %v4407_v30 = vmax.f32 %v4404_v4, 0.0  ;;  %v4405_v13 = vadd.f32 %v4402_v58, %v4396_v8 }
 0x37c   :  { %v4408_v16 = vmax.f32 %v4405_v13, 0.0  ;;  %v4436_v36 = vmul.f32 %v4431_v11, %v4407_v30 }
 0x37e   :  { %v4437_v19 = vmul.f32 %v4432_v17, %v4408_v16  ;;  %4442 = vrot.lane.b32.xlu0 %v4436_v36, %s6322_s1 }
 0x380   :  { %4444 = vrot.lane.b32.xlu1 %v4437_v19, %s6322_s1 }
 0x382   :  { %4446 = vrot.lane.b32.xlu0 %v4438_v20, %s6322_s1 }
 0x3f0   :  { %v4443_v40 = vpop.permute.xlu0 %4442 }
 0x3f1   :  { %4454 = vst.msk [vmem:[#allocation2 + $0x18] sm:$0xff] %vm1525_vm11, %v4443_v40 }
 0x3f2   :  { %v4445_v22 = vpop.permute.xlu1 %4444 }
 0x3f3   :  { %v4448_v23 = vsel %vm1519_vm12, %v4443_v40, %v4445_v22 }
 0x3f4   :  { %v4447_v48 = vpop.permute.xlu0 %4446 }
 0x3f5   :  { %v4449_v26 = vsel %vm1519_vm12, %v4445_v22, %v4447_v48 }
 0x3f6   :  { %4456 = vst.msk [vmem:[#allocation2 + $0x28] sm:$0xff] %vm1528_vm13, %v4449_v26 }
 0x3f8   :  { %v4457_v27 = vld [vmem:[#allocation2 + $0x18] sm:$0xff] }
 0x3f9   :  { %4765 = vrot.lane.b32.xlu0 %v4457_v27, %s6314_s25  ;;  %4465 = vrot.lane.b32.xlu1 %v4457_v27, %s6311_s22 }
 0x3fd   :  { %5083 = vrot.lane.b32.xlu0 %v4457_v27, %s6316_s27  ;;  %4924 = vrot.lane.b32.xlu1 %v4457_v27, %s6315_s26  ;;  %v4459_v51 = vld [vmem:[#allocation2 + $0x28] sm:$0xff] }
 0x401   :  { %5242 = vrot.lane.b32.xlu1 %v4457_v27, %s6317_s28  ;;  %4469 = vrot.lane.b32.xlu0 %v4459_v51, %s6311_s22 }
 0x405   :  { %4467 = vrot.lane.b32.xlu1 %v4448_v23, %s6311_s22  ;;  %5401 = vrot.lane.b32.xlu0 %v4457_v27, %s6318_s29 }
 0x409   :  { %5560 = vrot.lane.b32.xlu1 %v4457_v27, %s6320_s30  ;;  %4767 = vrot.lane.b32.xlu0 %v4448_v23, %s6314_s25 }
 0x40d   :  { %4769 = vrot.lane.b32.xlu1 %v4459_v51, %s6314_s25  ;;  %4928 = vrot.lane.b32.xlu0 %v4459_v51, %s6315_s26  ;;  %s5901_s25 = sshll.u32 %s6323_s4, 4  ;;  %s5902_s25 = int_to_ptr.vmem [resolvable:$true] %s5901_s25 }
 0x40e   :  { %p6294_p1 = scmp.lt.s32.totalorder %s5902_s25, %s5902_s25 }
 0x411   :  { %4926 = vrot.lane.b32.xlu1 %v4448_v23, %s6315_s26  ;;  %5085 = vrot.lane.b32.xlu0 %v4448_v23, %s6316_s27  ;;  %s6289_s26 = scalar_lea.vmem %s5902_s25, 768 }
 0x412   :  { %p6290_p0 = scmp.ne.s32.totalorder %s5902_s25, %s6289_s26  ;;  %p6295_p2 = scmp.lt.s32.totalorder %s6289_s26, %s6289_s26 }
 0x414   :  { %p6296_p3 = por %p6295_p2, %p6294_p1 }
 0x415   :  { %5087 = vrot.lane.b32.xlu1 %v4459_v51, %s6316_s27  ;;  %5246 = vrot.lane.b32.xlu0 %v4459_v51, %s6317_s28 }
 0x416   :  { %p6297_p4 = pnand %p6296_p3, %p6290_p0 }
 0x419   :  { %5244 = vrot.lane.b32.xlu1 %v4448_v23, %s6317_s28  ;;  %5403 = vrot.lane.b32.xlu0 %v4448_v23, %s6318_s29 }
 0x41d   :  { %5405 = vrot.lane.b32.xlu1 %v4459_v51, %s6318_s29  ;;  %5564 = vrot.lane.b32.xlu0 %v4459_v51, %s6320_s30 }
 0x421   :  { %5562 = vrot.lane.b32.xlu1 %v4448_v23, %s6320_s30  ;;  %5721 = vrot.lane.b32.xlu0 %v4448_v23, %s6321_s6 }
 0x425   :  { %5723 = vrot.lane.b32.xlu1 %v4459_v51, %s6321_s6  ;;  %5719 = vrot.lane.b32.xlu0 %v4457_v27, %s6321_s6 }
 0x429   :  { %2961 = vperm.xlu1 %6287, %v2958_v28   ;;  %5880 = vperm.xlu0 %6286, %v2958_v28  }
 0x46b   :  { %v4466_v37 = vpop.permute.xlu1 %4465  ;;  %v4766_v39 = vpop.permute.xlu0 %4765 }
 0x46f   :  { %v4925_v41 = vpop.permute.xlu1 %4924  ;;  %v5084_v42 = vpop.permute.xlu0 %5083 }
 0x473   :  { %v5243_v45 = vpop.permute.xlu1 %5242  ;;  %v4470_v46 = vpop.permute.xlu0 %4469 }
 0x474   :  { %6227 = vmatpush3.msra.mxu1 %v4470_v46 }
 0x475   :  { %6231 = vmatprep.subr.mxu1 %v6946_v10  ;;  %6229 = vmatmul.mubr.msk.f32.vlgmr.msra.gmra.mxu1 %vm53_vm2, %v6743_v60 }
 0x476   :  { %6232 = vmatpush3.msra.mxu1 %v4459_v51  ;;  %6233 = vmatprep.mubr.msk.f32.mxu1 %vm6313_vm0, %v6946_v10 }
 0x477   :  { %v4468_v52 = vpop.permute.xlu1 %4467  ;;  %v7043_v54 = vpop.permute.xlu0 %5401  ;;  %6236 = vmatprep.subr.mxu1 %v6946_v10 }
 0x478   :  { %v4471_v57 = vsel %vm47_vm1, %v4466_v37, %v4468_v52  ;;  %v4472_v58 = vsel %vm47_vm1, %v4468_v52, %v4470_v46 }
 0x479   :  { %4509 = vmatprep.subr.mxu0 %v4472_v58  ;;  %6234 = vmatmul.mubr.msk.f32.vlgmr.msra.gmra.mxu1 %vm53_vm2, %v6753_v1 }
 0x47a   :  { %4510 = vmatpush1.msra.mxu0 %v4471_v57  ;;  %6238 = vmatprep.mubr.msk.f32.mxu1 %vm6313_vm0, %v6946_v10 }
 0x47b   :  { %v7052_v59 = vpop.permute.xlu1 %5560  ;;  %5994 = vmatmul.mubr.msk.f32.vlgmr.msra.gmra.mxu0 %vm53_vm2, %v6743_v60  ;;  %4653 = vmatprep.subr.mxu0 %v4448_v23  ;;  %v4768_v56 = vpop.permute.xlu0 %4767 }
 0x47c   :  { %4654 = vmatpush1.msra.mxu0 %v4457_v27  ;;  %4687 = vmatprep.mubr.f32.mxu0 %v6946_v10  ;;  %v4771_v9 = vsel %vm350_vm3, %v4766_v39, %v4768_v56 }
 0x47f   :  { %v4770_v7 = vpop.permute.xlu1 %4769  ;;  %5996 = vmatmul.mubr.msk.f32.vlgmr.msra.gmra.mxu0 %vm53_vm2, %v6753_v1  ;;  %v4929_v61 = vpop.permute.xlu0 %4928 }
 0x480   :  { %6237 = vmatpush3.msra.mxu1 %v4770_v7  ;;  %v4772_v62 = vsel %vm350_vm3, %v4768_v56, %v4770_v7  ;;  %4843 = vmatprep.mubr.f32.mxu0 %v6946_v10 }
 0x481   :  { %4809 = vmatprep.subr.mxu0 %v4772_v62  ;;  %6239 = vmatmul.mubr.msk.f32.vlgmr.msra.gmra.mxu1 %vm53_vm2, %v6773_v5 }
 0x482   :  { %6241 = vmatprep.subr.mxu1 %v6946_v10  ;;  %4810 = vmatpush1.msra.mxu0 %v4771_v9 }
 0x483   :  { %6242 = vmatpush3.msra.mxu1 %v4929_v61  ;;  %v4927_v60 = vpop.permute.xlu1 %4926  ;;  %5999 = vmatmul.mubr.msk.f32.vlgmr.msra.gmra.mxu0 %vm53_vm2, %v6773_v5  ;;  %v5086_v1 = vpop.permute.xlu0 %5085 }
 0x484   :  { %v4930_v63 = vsel %vm511_vm4, %v4925_v41, %v4927_v60  ;;  %6243 = vmatprep.mubr.msk.f32.mxu1 %vm6313_vm0, %v6946_v10  ;;  %v4931_v49 = vsel %vm511_vm4, %v4927_v60, %v4929_v61  ;;  %5002 = vmatprep.mubr.f32.mxu0 %v6946_v10  ;;  %v5089_v33 = vsel %vm672_vm5, %v5084_v42, %v5086_v1 }
 0x485   :  { %4968 = vmatprep.subr.mxu0 %v4931_v49  ;;  %6244 = vmatmul.mubr.msk.f32.vlgmr.msra.gmra.mxu1 %vm53_vm2, %v6788_v12 }
 0x486   :  { %4969 = vmatpush1.msra.mxu0 %v4930_v63  ;;  %6246 = vmatprep.subr.mxu1 %v6946_v10 }
 0x487   :  { %v5088_v14 = vpop.permute.xlu1 %5087  ;;  %6002 = vmatmul.mubr.msk.f32.vlgmr.msra.gmra.mxu0 %vm53_vm2, %v6788_v12  ;;  %v5247_v5 = vpop.permute.xlu0 %5246  ;;  %6248 = vmatprep.mubr.msk.f32.mxu1 %vm6313_vm0, %v6946_v10 }
 0x488   :  { %6247 = vmatpush3.msra.mxu1 %v5088_v14  ;;  %v5090_v31 = vsel %vm672_vm5, %v5086_v1, %v5088_v14  ;;  %5161 = vmatprep.mubr.f32.mxu0 %v6946_v10 }
 0x489   :  { %5127 = vmatprep.subr.mxu0 %v5090_v31  ;;  %6249 = vmatmul.mubr.msk.f32.vlgmr.msra.gmra.mxu1 %vm53_vm2, %v6803_v18 }
 0x48a   :  { %6251 = vmatprep.subr.mxu1 %v6946_v10  ;;  %5128 = vmatpush1.msra.mxu0 %v5089_v33 }
 0x48b   :  { %6252 = vmatpush3.msra.mxu1 %v5247_v5  ;;  %v5245_v12 = vpop.permute.xlu1 %5244  ;;  %6005 = vmatmul.mubr.msk.f32.vlgmr.msra.gmra.mxu0 %vm53_vm2, %v6803_v18  ;;  %v5404_v50 = vpop.permute.xlu0 %5403 }
 0x48c   :  { %v5248_v0 = vsel %vm833_vm6, %v5243_v45, %v5245_v12  ;;  %6253 = vmatprep.mubr.msk.f32.mxu1 %vm6313_vm0, %v6946_v10  ;;  %v5249_v3 = vsel %vm833_vm6, %v5245_v12, %v5247_v5  ;;  %5320 = vmatprep.mubr.f32.mxu0 %v6946_v10  ;;  %v5407_v8 = vsel %vm994_vm7, %v7043_v54, %v5404_v50 }
 0x48d   :  { %5286 = vmatprep.subr.mxu0 %v5249_v3  ;;  %6254 = vmatmul.mubr.msk.f32.vlgmr.msra.gmra.mxu1 %vm53_vm2, %v6818_v24 }
 0x48e   :  { %5287 = vmatpush1.msra.mxu0 %v5248_v0  ;;  %6256 = vmatprep.subr.mxu1 %v6946_v10 }
 0x48f   :  { %v5406_v25 = vpop.permute.xlu1 %5405  ;;  %6008 = vmatmul.mubr.msk.f32.vlgmr.msra.gmra.mxu0 %vm53_vm2, %v6818_v24  ;;  %v5565_v18 = vpop.permute.xlu0 %5564  ;;  %6258 = vmatprep.mubr.msk.f32.mxu1 %vm6313_vm0, %v6946_v10 }
 0x490   :  { %6257 = vmatpush3.msra.mxu1 %v5406_v25  ;;  %v5408_v4 = vsel %vm994_vm7, %v5404_v50, %v5406_v25  ;;  %5479 = vmatprep.mubr.f32.mxu0 %v6946_v10 }
 0x491   :  { %5445 = vmatprep.subr.mxu0 %v5408_v4  ;;  %6259 = vmatmul.mubr.msk.f32.vlgmr.msra.gmra.mxu1 %vm53_vm2, %v6834_v38 }
 0x492   :  { %6261 = vmatprep.subr.mxu1 %v6946_v10  ;;  %5446 = vmatpush1.msra.mxu0 %v5407_v8 }
 0x493   :  { %6262 = vmatpush3.msra.mxu1 %v5565_v18  ;;  %v5563_v24 = vpop.permute.xlu1 %5562  ;;  %6011 = vmatmul.mubr.msk.f32.vlgmr.msra.gmra.mxu0 %vm53_vm2, %v6834_v38  ;;  %v5722_v11 = vpop.permute.xlu0 %5721 }
 0x494   :  { %v5566_v30 = vsel %vm1155_vm8, %v7052_v59, %v5563_v24  ;;  %6263 = vmatprep.mubr.msk.f32.mxu1 %vm6313_vm0, %v6946_v10  ;;  %v5567_v13 = vsel %vm1155_vm8, %v5563_v24, %v5565_v18  ;;  %5638 = vmatprep.mubr.f32.mxu0 %v6946_v10 }
 0x495   :  { %5604 = vmatprep.subr.mxu0 %v5567_v13  ;;  %6264 = vmatmul.mubr.msk.f32.vlgmr.msra.gmra.mxu1 %vm53_vm2, %v6850_v44 }
 0x496   :  { %5605 = vmatpush1.msra.mxu0 %v5566_v30  ;;  %6266 = vmatprep.subr.mxu1 %v6946_v10 }
 0x497   :  { %v5724_v2 = vpop.permute.xlu1 %5723  ;;  %6014 = vmatmul.mubr.msk.f32.vlgmr.msra.gmra.mxu0 %vm53_vm2, %v6850_v44  ;;  %v5720_v38 = vpop.permute.xlu0 %5719  ;;  %6268 = vmatprep.mubr.msk.f32.mxu1 %vm6313_vm0, %v6946_v10 }
 0x498   :  { %v5725_v15 = vsel %vm1316_vm9, %v5720_v38, %v5722_v11  ;;  %6267 = vmatpush3.msra.mxu1 %v5724_v2  ;;  %v5726_v16 = vsel %vm1316_vm9, %v5722_v11, %v5724_v2  ;;  %5797 = vmatprep.mubr.f32.mxu0 %v6946_v10 }
 0x499   :  { %5763 = vmatprep.subr.mxu0 %v5726_v16  ;;  %6269 = vmatmul.mubr.msk.f32.vlgmr.msra.gmra.mxu1 %vm53_vm2, %v6866_v53 }
 0x49a   :  { %5764 = vmatpush1.msra.mxu0 %v5725_v15 }
 0x49b   :  { %6017 = vmatmul.mubr.msk.f32.vlgmr.msra.gmra.mxu0 %vm53_vm2, %v6866_v53 }
 0x4a4   :  { %v2962_v44 = vpop.permute.xlu1 %2961 }
 0x4a5   :  { %v2964_v36 = vadd.f32 %v2962_v44, %v6998_v47  ;;  %v2965_v17 = vadd.f32 %v2962_v44, %v7000_v55  ;;  %v2966_v19 = vadd.f32 %v2962_v44, %v6996_v43  ;;  %v5881_v44 = vpop.permute.xlu0 %5880 }
 0x4a7   :  { %v2967_v20 = vadd.f32 %v2964_v36, %v6503_v34  ;;  %v2968_v40 = vadd.f32 %v2965_v17, %v6510_v35  ;;  %v2969_v10 = vadd.f32 %v2966_v19, %v6498_v32 }
 0x4a9   :  { %v2970_v22 = vmax.f32 %v2967_v20, 0.0  ;;  %v2971_v23 = vmax.f32 %v2968_v40, 0.0  ;;  %v2972_v48 = vmax.f32 %v2969_v10, 0.0 }
 0x4ab   :  { %2973 = vst [vmem:[#allocation3] sm:$0xff] %v2970_v22  ;;  %2974 = vst [vmem:[#allocation3 + $0x8] sm:$0xff] %v2971_v23 }
 0x4ac   :  { %2976 = vst.msk [vmem:[#allocation3 + $0x10] sm:$0xff] %vm2975_vm14, %v2972_v48 }
 0x535   :  { %v4616_v53 = vpop.f32.mrf.mxu1 }
 0x537   :  { %v6230_v47 = vpop.f32.mrf.mxu1 }
 0x539   :  { %v4760_v26 = vpop.f32.mrf.mxu1 }
 0x53a   :  { %v4761_v57 = vadd.f32 %v4760_v26, %v4616_v53 }
 0x53b   :  { %v4545_v55 = vpop.f32.mrf.mxu0  ;;  %v6235_v27 = vpop.f32.mrf.mxu1 }
 0x53d   :  { %v4547_v43 = vpop.f32.mrf.mxu0 }
 0x53f   :  { %v4689_v51 = vpop.f32.mrf.mxu0 }
 0x540   :  { %v4690_v56 = vadd.f32 %v4689_v51, %v4545_v55 }
 0x541   :  { %v4691_v34 = vpop.f32.mrf.mxu0  ;;  %v4916_v28 = vpop.f32.mrf.mxu1 }
 0x542   :  { %v4922_v7 = vadd.f32 %v4916_v28, %v4761_v57  ;;  %v4692_v9 = vadd.f32 %v4691_v34, %v4547_v43 }
 0x543   :  { %v4845_v35 = vpop.f32.mrf.mxu0  ;;  %v6240_v37 = vpop.f32.mrf.mxu1 }
 0x544   :  { %v4920_v60 = vadd.f32 %v4845_v35, %v4690_v56 }
 0x545   :  { %v4847_v32 = vpop.f32.mrf.mxu0  ;;  %v5075_v39 = vpop.f32.mrf.mxu1 }
 0x546   :  { %v5081_v1 = vadd.f32 %v5075_v39, %v4922_v7  ;;  %v4921_v14 = vadd.f32 %v4847_v32, %v4692_v9 }
 0x547   :  { %v5004_v41 = vpop.f32.mrf.mxu0  ;;  %v6245_v42 = vpop.f32.mrf.mxu1 }
 0x548   :  { %v5079_v5 = vadd.f32 %v5004_v41, %v4920_v60 }
 0x549   :  { %v5006_v45 = vpop.f32.mrf.mxu0  ;;  %v5234_v46 = vpop.f32.mrf.mxu1 }
 0x54a   :  { %v5240_v31 = vadd.f32 %v5234_v46, %v5081_v1  ;;  %v5080_v50 = vadd.f32 %v5006_v45, %v4921_v14 }
 0x54b   :  { %v5163_v52 = vpop.f32.mrf.mxu0  ;;  %v6250_v54 = vpop.f32.mrf.mxu1 }
 0x54c   :  { %v5238_v0 = vadd.f32 %v5163_v52, %v5079_v5 }
 0x54d   :  { %v5165_v58 = vpop.f32.mrf.mxu0  ;;  %v5393_v59 = vpop.f32.mrf.mxu1 }
 0x54e   :  { %v5399_v3 = vadd.f32 %v5393_v59, %v5240_v31  ;;  %v5239_v4 = vadd.f32 %v5165_v58, %v5080_v50 }
 0x54f   :  { %v5322_v61 = vpop.f32.mrf.mxu0  ;;  %v6255_v62 = vpop.f32.mrf.mxu1 }
 0x550   :  { %v5397_v8 = vadd.f32 %v5322_v61, %v5238_v0 }
 0x551   :  { %v5324_v63 = vpop.f32.mrf.mxu0  ;;  %v5552_v49 = vpop.f32.mrf.mxu1 }
 0x552   :  { %v5558_v24 = vadd.f32 %v5552_v49, %v5399_v3  ;;  %v5398_v13 = vadd.f32 %v5324_v63, %v5239_v4 }
 0x553   :  { %v5481_v33 = vpop.f32.mrf.mxu0  ;;  %v6260_v12 = vpop.f32.mrf.mxu1 }
 0x554   :  { %v5556_v2 = vadd.f32 %v5481_v33, %v5397_v8 }
 0x555   :  { %v5483_v25 = vpop.f32.mrf.mxu0  ;;  %v5711_v18 = vpop.f32.mrf.mxu1 }
 0x556   :  { %v5717_v38 = vadd.f32 %v5711_v18, %v5558_v24  ;;  %v5557_v36 = vadd.f32 %v5483_v25, %v5398_v13 }
 0x557   :  { %v5640_v11 = vpop.f32.mrf.mxu0  ;;  %v6265_v30 = vpop.f32.mrf.mxu1 }
 0x558   :  { %v5715_v17 = vadd.f32 %v5640_v11, %v5556_v2 }
 0x559   :  { %v5642_v15 = vpop.f32.mrf.mxu0  ;;  %v5870_v16 = vpop.f32.mrf.mxu1 }
 0x55a   :  { %v5876_v19 = vadd.f32 %v5870_v16, %v5717_v38  ;;  %v5716_v10 = vadd.f32 %v5642_v15, %v5557_v36 }
 0x55b   :  { %v5799_v20 = vpop.f32.mrf.mxu0  ;;  %v6270_v40 = vpop.f32.mrf.mxu1 }
 0x55c   :  { %v5885_v22 = vadd.f32 %v5881_v44, %v5876_v19  ;;  %v5874_v23 = vadd.f32 %v5799_v20, %v5715_v17 }
 0x55d   :  { %v5801_v48 = vpop.f32.mrf.mxu0 }
 0x55e   :  { %v5888_v53 = vadd.f32 %v5885_v22, %v6909_v29  ;;  %v5883_v47 = vadd.f32 %v5881_v44, %v5874_v23  ;;  %v5875_v26 = vadd.f32 %v5801_v48, %v5716_v10 }
 0x560   :  { %v5891_v55 = vmax.f32 %v5888_v53, 0.0  ;;  %v5886_v27 = vadd.f32 %v5883_v47, %v6938_v6  ;;  %v5884_v43 = vadd.f32 %v5881_v44, %v5875_v26 }
 0x562   :  { %5895 = vst.msk [vmem:[#allocation3 + $0x28] sm:$0xff] %vm2975_vm14, %v5891_v55  ;;  %v5889_v51 = vmax.f32 %v5886_v27, 0.0  ;;  %v5887_v34 = vadd.f32 %v5884_v43, %v6929_v21 }
 0x564   :  { %5893 = vst [vmem:[#allocation3 + $0x18] sm:$0xff] %v5889_v51  ;;  %v5890_v28 = vmax.f32 %v5887_v34, 0.0 }
 0x566   :  { %5894 = vst [vmem:[#allocation3 + $0x20] sm:$0xff] %v5890_v28 }
 0x567   :  { %6300 = shalt.err (!%p6297_p4)
}
 0x568   :  { %s6324_s27 = smov 384   ;;  %s6325_s28 = smov 24  }
 0x569   :  { %5907 = dma.vmem_to_hbm [thread:$0]  %s5902_s25, 768, %s7147_s5, [#allocation4], %s6324_s27, %s6324_s27, %s6325_s28  }
 0x56a   :  { %6309 = dma.done.wait [#allocation4], 768  }
 0x56b   :  { %6310 = vsyncadd [#allocation4], 4294966528 }
 0x56c   :  { %5911 = vsyncpa [#allocation4], 1 }

</bundles_post_ra>
